<compile_context>
chip_gen: v7x
topology: tpu7x:2x2x1
jax: 0.10.0
libtpu: 0.0.40
codegen_flags: <defaults>
</compile_context>

<pallas_src>
import functools

import jax
import jax.numpy as jnp
from jax import lax
from jax.experimental import pallas as pl
from jax.experimental.pallas import tpu as pltpu


def _round_up(v, m):
    return (v + m - 1) // m * m


def _sigmoid(z):
    # One EUP op per gate (instead of exp + reciprocal).
    return 0.5 * jnp.tanh(0.5 * z) + 0.5


# ----------------------------- fused Pallas kernel ----------------------------- #

def _make_lstm_kernel(num_layers, time_chunk, bb, h_p, mxu_dtype, unroll):
    n_act = min(num_layers - 1, 2)   # inter-layer activation ping-pong buffers

    def kernel(*refs):
        n_in = 1 + 3 * num_layers + 2            # x, (wih, whh, b)*L, wfc, bfc
        x_ref = refs[0]
        w_refs = refs[1:n_in]
        out_ref = refs[n_in]
        scratch = refs[n_in + 1:]
        acts = scratch[:n_act]
        zx_scr, h_st, c_st = scratch[n_act:]

        k = pl.program_id(1)                     # time-chunk index ("arbitrary" axis)

        @pl.when(k == 0)
        def _init():                             # h0 = c0 = 0 (per batch block)
            h_st[...] = jnp.zeros_like(h_st)
            c_st[...] = jnp.zeros_like(c_st)

        for layer in range(num_layers):
            wih = w_refs[3 * layer]
            whh = w_refs[3 * layer + 1]
            bias = w_refs[3 * layer + 2]
            is_last_layer = layer == num_layers - 1

            # Hoisted input projection + bias: ONE big MXU matmul per (layer, chunk),
            # off the serial recurrence path.
            if layer == 0:
                flat = x_ref[...].reshape(time_chunk * bb, x_ref.shape[-1])
            else:
                flat = acts[(layer - 1) % n_act][...].reshape(time_chunk * bb, h_p)
            zx = jnp.dot(flat, wih[...], preferred_element_type=jnp.float32) + bias[...]
            zx_scr[...] = zx.reshape(time_chunk, bb, 4 * h_p)

            out_act = None if is_last_layer else acts[layer % n_act]

            def step(t, carry, layer=layer, whh=whh, out_act=out_act):
                h_prev = h_st[layer]                     # (bb, Hp) bf16: no cast on chain
                c_prev = c_st[layer]                     # (bb, Hp) f32
                z = zx_scr[t] + jnp.dot(h_prev, whh[...],
                                        preferred_element_type=jnp.float32)
                i = _sigmoid(z[:, 0 * h_p:1 * h_p])      # lane-aligned gate slices
                f = _sigmoid(z[:, 1 * h_p:2 * h_p])
                g = jnp.tanh(z[:, 2 * h_p:3 * h_p])
                o = _sigmoid(z[:, 3 * h_p:4 * h_p])
                c = f * c_prev + i * g
                h = (o * jnp.tanh(c)).astype(mxu_dtype)  # cast once, off the load path
                h_st[layer] = h
                c_st[layer] = c
                if out_act is not None:          # last layer: skip (T,B,H) writeback
                    out_act[t] = h
                return carry

            lax.fori_loop(0, time_chunk, step, 0, unroll=unroll)

        # Fused FC epilogue on the last chunk: out = h_T @ W_fc^T + b_fc.
        @pl.when(k == pl.num_programs(1) - 1)
        def _fc():
            wfc = w_refs[3 * num_layers]
            bfc = w_refs[3 * num_layers + 1]
            out_ref[...] = (
                jnp.dot(h_st[num_layers - 1], wfc[...],
                        preferred_element_type=jnp.float32)
                + bfc[...]
            ).astype(out_ref.dtype)

    return kernel


# ------------------------------ JAX wrapper ------------------------------------ #

def _full_spec(shape):
    shape = tuple(int(s) for s in shape)
    return pl.BlockSpec(shape, lambda b, k, _s=shape: (0,) * len(_s))


@functools.partial(jax.jit,
                   static_argnames=("num_layers", "time_chunk", "batch_block",
                                    "mxu_dtype"))
def lstm_forward(x, kparams, *, num_layers, time_chunk=None, batch_block=None,
                 mxu_dtype=jnp.bfloat16):
    """x: (B, T, input_dim) f32 batch_first (PyTorch layout). Returns (B, output_dim)."""
    B, T, d_in = x.shape
    layer_params = [kparams[f"layer{l}"] for l in range(num_layers)]
    w_fc_t, b_fc = kparams["fc"]
    h_p = int(layer_params[0][1].shape[0])     # whh_t is (Hp, 4Hp)
    out_dim = int(w_fc_t.shape[1])
    itemsize = jnp.dtype(mxu_dtype).itemsize
    n_act = min(num_layers - 1, 2)

    # Batch padded to full bf16 (16,128) tiles.  batch_block < Bp puts a "parallel"
    # leading grid axis in front (feeds v7x's 2nd TensorCore); default is one block,
    # which is best when the per-step matmul latency is weight-load dominated.
    b_p = _round_up(B, 16)
    bb = b_p if batch_block is None else _round_up(min(batch_block, b_p), 16)
    b_p = _round_up(b_p, bb)
    n_bblocks = b_p // bb

    # --- VMEM budget (per chip generation) and time-chunk selection -------------
    weight_args = []
    for (wih_t, whh_t, bias) in layer_params:
        weight_args += [wih_t, whh_t, bias]
    weight_args += [w_fc_t, b_fc]
    weight_bytes = sum(int(a.size) * a.dtype.itemsize for a in weight_args)

    try:
        phys_vmem = int(pltpu.get_tpu_info().vmem_capacity_bytes)
    except Exception:
        phys_vmem = 64 << 20                     # conservative (v7x per-TC) fallback
    vmem_cap = (phys_vmem * 3) // 4              # headroom for compiler-internal scratch

    fixed_bytes = (2 * weight_bytes              # Pallas double-buffers every input
                   + num_layers * bb * h_p * itemsize        # h state (bf16)
                   + num_layers * bb * h_p * 4               # c state (f32)
                   + 2 * bb * out_dim * 4)                   # out block (dbl-buffered)

    def _chunk_bytes(c):
        return (2 * c * bb * d_in * itemsize     # x chunk, double-buffered
                + c * bb * 4 * h_p * 4           # hoisted x@Wih scratch (f32)
                + n_act * c * bb * h_p * itemsize)

    if time_chunk is None or T % time_chunk != 0:
        # Largest divisor of T whose chunk footprint fits the VMEM budget.
        # TODO(synk): masked ragged-tail handling would allow non-divisor chunks.
        budget = vmem_cap - fixed_bytes - (1 << 20)
        time_chunk = 1
        for c in range(1, T + 1):
            if T % c == 0 and _chunk_bytes(c) <= budget:
                time_chunk = c
    num_chunks = T // time_chunk

    needed = fixed_bytes + _chunk_bytes(time_chunk)
    vmem_budget = int(min(max(int(needed * 1.5), 8 << 20), vmem_cap))

    # Unroll bounded by vreg pressure (live z tile is bb x 4Hp f32 per unrolled step).
    unroll = max(1, min(time_chunk, 8, 1024 // h_p))

    # One-time layout fixup of the (small) input: pad batch to full tiles, go
    # time-major so each timestep is a contiguous (Bp, Din) slab, cast to MXU dtype.
    x_p = jnp.pad(x, ((0, b_p - B), (0, 0), (0, 0)))
    x_tm = jnp.transpose(x_p, (1, 0, 2)).astype(mxu_dtype)

    args = [x_tm]
    in_specs = [pl.BlockSpec((time_chunk, bb, d_in), lambda b, k: (k, b, 0))]
    for (wih_t, whh_t, bias) in layer_params:
        args += [wih_t, whh_t, bias]
        in_specs += [_full_spec(wih_t.shape), _full_spec(whh_t.shape),
                     _full_spec(bias.shape)]
    args += [w_fc_t, b_fc]
    in_specs += [_full_spec(w_fc_t.shape), _full_spec(b_fc.shape)]

    scratch_shapes = (
        [pltpu.VMEM((time_chunk, bb, h_p), mxu_dtype)] * n_act        # act ping-pong
        + [pltpu.VMEM((time_chunk, bb, 4 * h_p), jnp.float32),        # hoisted x@Wih+b
           pltpu.VMEM((num_layers, bb, h_p), mxu_dtype),              # h state (bf16)
           pltpu.VMEM((num_layers, bb, h_p), jnp.float32)]            # c state (f32)
    )

    kernel = _make_lstm_kernel(num_layers, time_chunk, bb, h_p, mxu_dtype, unroll)
    out_p = pl.pallas_call(
        kernel,
        out_shape=jax.ShapeDtypeStruct((b_p, out_dim), jnp.float32),
        grid=(n_bblocks, num_chunks),
        in_specs=in_specs,
        out_specs=pl.BlockSpec((bb, out_dim), lambda b, k: (b, 0)),
        scratch_shapes=scratch_shapes,
        compiler_params=pltpu.CompilerParams(
            dimension_semantics=("parallel", "arbitrary"),  # recurrence across chunks
            vmem_limit_bytes=vmem_budget),
    )(*args)
    return out_p[:B]


# ------------------------- parameter init / preparation ------------------------- #

def init_params(key, input_dim, hidden_dim, output_dim, num_layers):
    """Raw PyTorch-shaped params: uniform(-1/sqrt(H), 1/sqrt(H))."""
    params = {}
    bound = 1.0 / jnp.sqrt(jnp.float32(hidden_dim))
    for layer in range(num_layers):
        d_in = input_dim if layer == 0 else hidden_dim
        key, k1, k2, k3, k4 = jax.random.split(key, 5)
        w_ih = jax.random.uniform(k1, (4 * hidden_dim, d_in), jnp.float32, -bound, bound)
        w_hh = jax.random.uniform(k2, (4 * hidden_dim, hidden_dim), jnp.float32, -bound, bound)
        b_ih = jax.random.uniform(k3, (4 * hidden_dim,), jnp.float32, -bound, bound)
        b_hh = jax.random.uniform(k4, (4 * hidden_dim,), jnp.float32, -bound, bound)
        params[f"layer{layer}"] = (w_ih, w_hh, b_ih, b_hh)
    key, k1, k2 = jax.random.split(key, 3)
    w_fc = jax.random.uniform(k1, (output_dim, hidden_dim), jnp.float32, -bound, bound)
    b_fc = jax.random.uniform(k2, (output_dim,), jnp.float32, -bound, bound)
    params["fc"] = (w_fc, b_fc)
    return params


def _pad_gate_blocks(w, h, h_p):
    """(4h, ...) -> (4h_p, ...), zero-padding each [i, f, g, o] gate block to h_p."""
    tail = w.shape[1:]
    w4 = w.reshape((4, h) + tail)
    pad = [(0, 0), (0, h_p - h)] + [(0, 0)] * len(tail)
    return jnp.pad(w4, pad).reshape((4 * h_p,) + tail)


def prepare_params(raw, hidden_dim, num_layers, mxu_dtype=jnp.bfloat16):
    """Pad H -> Hp (mult of 128), transpose, sum biases, cast MXU operands to bf16."""
    h, h_p = hidden_dim, _round_up(hidden_dim, 128)
    kparams = {}
    for layer in range(num_layers):
        w_ih, w_hh, b_ih, b_hh = raw[f"layer{layer}"]
        w_ih = _pad_gate_blocks(w_ih, h, h_p)                 # (4Hp, Din|H)
        if layer > 0:
            w_ih = jnp.pad(w_ih, ((0, 0), (0, h_p - h)))      # (4Hp, Hp)
        w_hh = _pad_gate_blocks(w_hh, h, h_p)                 # (4Hp, H)
        w_hh = jnp.pad(w_hh, ((0, 0), (0, h_p - h)))          # (4Hp, Hp)
        bias = _pad_gate_blocks(b_ih + b_hh, h, h_p).reshape(1, 4 * h_p)
        kparams[f"layer{layer}"] = (
            w_ih.T.astype(mxu_dtype),        # (Din|Hp, 4Hp)
            w_hh.T.astype(mxu_dtype),        # (Hp, 4Hp)
            bias.astype(jnp.float32),        # (1, 4Hp)
        )
    w_fc, b_fc = raw["fc"]
    w_fc = jnp.pad(w_fc, ((0, 0), (0, h_p - h)))              # (O, Hp)
    kparams["fc"] = (w_fc.T.astype(mxu_dtype),                # (Hp, O)
                     b_fc.reshape(1, -1).astype(jnp.float32))
    return kparams


# ------------------------------ pure-JAX reference ------------------------------ #

def _lstm_reference(x, raw, num_layers, hidden_dim):
    """Float32 reference matching torch nn.LSTM(batch_first=True) + Linear."""
    B, T, _ = x.shape
    inp = x
    for l in range(num_layers):
        w_ih, w_hh, b_ih, b_hh = raw[f"layer{l}"]
        h = jnp.zeros((B, hidden_dim), jnp.float32)
        c = jnp.zeros((B, hidden_dim), jnp.float32)
        outs = []
        for t in range(T):
            z = inp[:, t] @ w_ih.T + b_ih + h @ w_hh.T + b_hh
            i, f, g, o = jnp.split(z, 4, axis=-1)
            i, f, o = jax.nn.sigmoid(i), jax.nn.sigmoid(f), jax.nn.sigmoid(o)
            g = jnp.tanh(g)
            c = f * c + i * g
            h = o * jnp.tanh(c)
            outs.append(h)
        inp = jnp.stack(outs, axis=1)
    w_fc, b_fc = raw["fc"]
    return inp[:, -1] @ w_fc.T + b_fc


if __name__ == "__main__":
    # Small shapes consistent with the module:
    #   batch=2, seq=8, input_dim=4, hidden_dim=32, num_layers=2, output_dim=4
    B, T, INPUT_DIM, HIDDEN_DIM, NUM_LAYERS, OUTPUT_DIM = 2, 8, 4, 32, 2, 4

    key = jax.random.PRNGKey(0)
    key, xkey = jax.random.split(key)
    x = jax.random.normal(xkey, (B, T, INPUT_DIM), jnp.float32)

    raw = init_params(key, INPUT_DIM, HIDDEN_DIM, OUTPUT_DIM, NUM_LAYERS)
    kparams = prepare_params(raw, HIDDEN_DIM, NUM_LAYERS)

    # time_chunk=4 -> 2 grid steps along time, exercising the chunked recurrence carry.
    out = lstm_forward(x, kparams, num_layers=NUM_LAYERS, time_chunk=4)
    jax.block_until_ready(out)
    assert out.shape == (B, OUTPUT_DIM), out.shape

    # Loose tolerance: MXU operands / inter-layer activations / h-state are bf16.
    ref = _lstm_reference(x, raw, NUM_LAYERS, HIDDEN_DIM)
    assert jnp.allclose(out, ref, rtol=5e-2, atol=5e-2), float(jnp.max(jnp.abs(out - ref)))
    print("KERNEL_OK")
</pallas_src>

<mosaic_0001>
module attributes {stable_mosaic.version = 11 : i64} {
  func.func @kernel(%arg0: i32, %arg1: i32, %arg2: memref<4x16x4xbf16, #tpu.memory_space<vmem>>, %arg3: memref<4x512xbf16, #tpu.memory_space<vmem>>, %arg4: memref<128x512xbf16, #tpu.memory_space<vmem>>, %arg5: memref<1x512xf32, #tpu.memory_space<vmem>>, %arg6: memref<128x512xbf16, #tpu.memory_space<vmem>>, %arg7: memref<128x512xbf16, #tpu.memory_space<vmem>>, %arg8: memref<1x512xf32, #tpu.memory_space<vmem>>, %arg9: memref<128x4xbf16, #tpu.memory_space<vmem>>, %arg10: memref<1x4xf32, #tpu.memory_space<vmem>>, %arg11: memref<16x4xf32, #tpu.memory_space<vmem>>, %arg12: memref<4x16x128xbf16, #tpu.memory_space<vmem>>, %arg13: memref<4x16x512xf32, #tpu.memory_space<vmem>>, %arg14: memref<2x16x128xbf16, #tpu.memory_space<vmem>>, %arg15: memref<2x16x128xf32, #tpu.memory_space<vmem>>) attributes {dimension_semantics = [#tpu.dimension_semantics<parallel>, #tpu.dimension_semantics<arbitrary>], iteration_bounds = array<i64: 1, 2>, scalar_prefetch = 0 : i64, scratch_operands = 4 : i64, tpu.core_type = #tpu.core_type<tc>, window_params = [{transform_indices = @transform_0, window_bounds = array<i64: 4, 16, 4>}, {pipeline_mode = #tpu.pipeline_mode<synchronous>, transform_indices = @transform_1, window_bounds = array<i64: 4, 512>}, {pipeline_mode = #tpu.pipeline_mode<synchronous>, transform_indices = @transform_2, window_bounds = array<i64: 128, 512>}, {pipeline_mode = #tpu.pipeline_mode<synchronous>, transform_indices = @transform_3, window_bounds = array<i64: 1, 512>}, {pipeline_mode = #tpu.pipeline_mode<synchronous>, transform_indices = @transform_4, window_bounds = array<i64: 128, 512>}, {pipeline_mode = #tpu.pipeline_mode<synchronous>, transform_indices = @transform_5, window_bounds = array<i64: 128, 512>}, {pipeline_mode = #tpu.pipeline_mode<synchronous>, transform_indices = @transform_6, window_bounds = array<i64: 1, 512>}, {pipeline_mode = #tpu.pipeline_mode<synchronous>, transform_indices = @transform_7, window_bounds = array<i64: 128, 4>}, {pipeline_mode = #tpu.pipeline_mode<synchronous>, transform_indices = @transform_8, window_bounds = array<i64: 1, 4>}, {transform_indices = @transform_9, window_bounds = array<i64: 16, 4>}]} {
    %c0_i32 = arith.constant 0 : i32
    %0 = arith.cmpi eq, %arg1, %c0_i32 : i32
    %1 = arith.extui %0 : i1 to i32
    %c0_i32_0 = arith.constant 0 : i32
    %2 = arith.cmpi ne, %1, %c0_i32_0 : i32
    scf.if %2 {
      %cst_244 = arith.constant 0.000000e+00 : bf16
      %424 = vector.broadcast %cst_244 : bf16 to vector<2x16x128xbf16>
      %c0_245 = arith.constant 0 : index
      %c0_246 = arith.constant 0 : index
      %c0_247 = arith.constant 0 : index
      %425 = vector.load %arg14[%c0_245, %c0_246, %c0_247] : memref<2x16x128xbf16, #tpu.memory_space<vmem>>, vector<2x16x128xbf16>
      tpu.vector_store %arg14[%c0_245, %c0_246, %c0_247], %424 {strides = array<i32>} : memref<2x16x128xbf16, #tpu.memory_space<vmem>>, vector<2x16x128xbf16>,
      %cst_248 = arith.constant 0.000000e+00 : f32
      %426 = vector.broadcast %cst_248 : f32 to vector<2x16x128xf32>
      %c0_249 = arith.constant 0 : index
      %c0_250 = arith.constant 0 : index
      %c0_251 = arith.constant 0 : index
      %427 = vector.load %arg15[%c0_249, %c0_250, %c0_251] : memref<2x16x128xf32, #tpu.memory_space<vmem>>, vector<2x16x128xf32>
      tpu.vector_store %arg15[%c0_249, %c0_250, %c0_251], %426 {strides = array<i32>} : memref<2x16x128xf32, #tpu.memory_space<vmem>>, vector<2x16x128xf32>,
    } else {
    }
    %c0 = arith.constant 0 : index
    %c0_1 = arith.constant 0 : index
    %c0_2 = arith.constant 0 : index
    %3 = vector.load %arg2[%c0, %c0_1, %c0_2] : memref<4x16x4xbf16, #tpu.memory_space<vmem>>, vector<4x16x4xbf16>
    %4 = vector.shape_cast %3 : vector<4x16x4xbf16> to vector<64x4xbf16>
    %c0_3 = arith.constant 0 : index
    %c0_4 = arith.constant 0 : index
    %5 = vector.load %arg3[%c0_3, %c0_4] : memref<4x512xbf16, #tpu.memory_space<vmem>>, vector<4x512xbf16>
    %cst = arith.constant dense<0.000000e+00> : vector<64x512xf32>
    %6 = tpu.matmul %4, %5, %cst {dimension_numbers = #tpu.dot_dimension_numbers<[1], [0], [0], [1], [0, 0, 1, 1], [], []>} : vector<64x4xbf16>, vector<4x512xbf16>, vector<64x512xf32> -> vector<64x512xf32>
    %c0_5 = arith.constant 0 : index
    %c0_6 = arith.constant 0 : index
    %7 = vector.load %arg5[%c0_5, %c0_6] : memref<1x512xf32, #tpu.memory_space<vmem>>, vector<1x512xf32>
    %8 = vector.broadcast %7 : vector<1x512xf32> to vector<64x512xf32>
    %9 = arith.addf %6, %8 : vector<64x512xf32>
    %10 = vector.shape_cast %9 : vector<64x512xf32> to vector<4x16x512xf32>
    %c0_7 = arith.constant 0 : index
    %c0_8 = arith.constant 0 : index
    %c0_9 = arith.constant 0 : index
    %11 = vector.load %arg13[%c0_7, %c0_8, %c0_9] : memref<4x16x512xf32, #tpu.memory_space<vmem>>, vector<4x16x512xf32>
    tpu.vector_store %arg13[%c0_7, %c0_8, %c0_9], %10 {strides = array<i32>} : memref<4x16x512xf32, #tpu.memory_space<vmem>>, vector<4x16x512xf32>,
    %c0_i32_10 = arith.constant 0 : i32
    %c0_11 = arith.constant 0 : index
    %c0_12 = arith.constant 0 : index
    %c0_13 = arith.constant 0 : index
    %12 = vector.load %arg14[%c0_11, %c0_12, %c0_13] : memref<2x16x128xbf16, #tpu.memory_space<vmem>>, vector<1x16x128xbf16>
    %13 = vector.shape_cast %12 : vector<1x16x128xbf16> to vector<16x128xbf16>
    %c0_14 = arith.constant 0 : index
    %c0_15 = arith.constant 0 : index
    %c0_16 = arith.constant 0 : index
    %14 = vector.load %arg15[%c0_14, %c0_15, %c0_16] : memref<2x16x128xf32, #tpu.memory_space<vmem>>, vector<1x16x128xf32>
    %15 = vector.shape_cast %14 : vector<1x16x128xf32> to vector<16x128xf32>
    %16 = arith.index_cast %c0_i32_10 : i32 to index
    %c0_17 = arith.constant 0 : index
    %c0_18 = arith.constant 0 : index
    %17 = vector.load %arg13[%16, %c0_17, %c0_18] : memref<4x16x512xf32, #tpu.memory_space<vmem>>, vector<1x16x512xf32>
    %18 = vector.shape_cast %17 : vector<1x16x512xf32> to vector<16x512xf32>
    %c0_19 = arith.constant 0 : index
    %c0_20 = arith.constant 0 : index
    %19 = vector.load %arg4[%c0_19, %c0_20] : memref<128x512xbf16, #tpu.memory_space<vmem>>, vector<128x512xbf16>
    %cst_21 = arith.constant dense<0.000000e+00> : vector<16x512xf32>
    %20 = tpu.matmul %13, %19, %cst_21 {dimension_numbers = #tpu.dot_dimension_numbers<[1], [0], [0], [1], [0, 0, 1, 1], [], []>} : vector<16x128xbf16>, vector<128x512xbf16>, vector<16x512xf32> -> vector<16x512xf32>
    %21 = arith.addf %18, %20 : vector<16x512xf32>
    %22 = vector.extract_strided_slice %21 {offsets = [0, 0], sizes = [16, 128], strides = [1, 1]} : vector<16x512xf32> to vector<16x128xf32>
    %cst_22 = arith.constant 5.000000e-01 : f32
    %23 = vector.broadcast %cst_22 : f32 to vector<16x128xf32>
    %24 = arith.mulf %23, %22 : vector<16x128xf32>
    %25 = math.tanh %24 : vector<16x128xf32>
    %cst_23 = arith.constant 5.000000e-01 : f32
    %26 = vector.broadcast %cst_23 : f32 to vector<16x128xf32>
    %27 = arith.mulf %26, %25 : vector<16x128xf32>
    %cst_24 = arith.constant 5.000000e-01 : f32
    %28 = vector.broadcast %cst_24 : f32 to vector<16x128xf32>
    %29 = arith.addf %27, %28 : vector<16x128xf32>
    %30 = vector.extract_strided_slice %21 {offsets = [0, 128], sizes = [16, 128], strides = [1, 1]} : vector<16x512xf32> to vector<16x128xf32>
    %cst_25 = arith.constant 5.000000e-01 : f32
    %31 = vector.broadcast %cst_25 : f32 to vector<16x128xf32>
    %32 = arith.mulf %31, %30 : vector<16x128xf32>
    %33 = math.tanh %32 : vector<16x128xf32>
    %cst_26 = arith.constant 5.000000e-01 : f32
    %34 = vector.broadcast %cst_26 : f32 to vector<16x128xf32>
    %35 = arith.mulf %34, %33 : vector<16x128xf32>
    %cst_27 = arith.constant 5.000000e-01 : f32
    %36 = vector.broadcast %cst_27 : f32 to vector<16x128xf32>
    %37 = arith.addf %35, %36 : vector<16x128xf32>
    %38 = vector.extract_strided_slice %21 {offsets = [0, 256], sizes = [16, 128], strides = [1, 1]} : vector<16x512xf32> to vector<16x128xf32>
    %39 = math.tanh %38 : vector<16x128xf32>
    %40 = vector.extract_strided_slice %21 {offsets = [0, 384], sizes = [16, 128], strides = [1, 1]} : vector<16x512xf32> to vector<16x128xf32>
    %cst_28 = arith.constant 5.000000e-01 : f32
    %41 = vector.broadcast %cst_28 : f32 to vector<16x128xf32>
    %42 = arith.mulf %41, %40 : vector<16x128xf32>
    %43 = math.tanh %42 : vector<16x128xf32>
    %cst_29 = arith.constant 5.000000e-01 : f32
    %44 = vector.broadcast %cst_29 : f32 to vector<16x128xf32>
    %45 = arith.mulf %44, %43 : vector<16x128xf32>
    %cst_30 = arith.constant 5.000000e-01 : f32
    %46 = vector.broadcast %cst_30 : f32 to vector<16x128xf32>
    %47 = arith.addf %45, %46 : vector<16x128xf32>
    %48 = arith.mulf %37, %15 : vector<16x128xf32>
    %49 = arith.mulf %29, %39 : vector<16x128xf32>
    %50 = arith.addf %48, %49 : vector<16x128xf32>
    %51 = math.tanh %50 : vector<16x128xf32>
    %52 = arith.mulf %47, %51 : vector<16x128xf32>
    %53 = arith.truncf %52 : vector<16x128xf32> to vector<16x128xbf16>
    %c0_31 = arith.constant 0 : index
    %c0_32 = arith.constant 0 : index
    %c0_33 = arith.constant 0 : index
    %54 = vector.load %arg14[%c0_31, %c0_32, %c0_33] : memref<2x16x128xbf16, #tpu.memory_space<vmem>>, vector<1x16x128xbf16>
    %55 = vector.shape_cast %54 : vector<1x16x128xbf16> to vector<16x128xbf16>
    %56 = vector.shape_cast %53 : vector<16x128xbf16> to vector<1x16x128xbf16>
    tpu.vector_store %arg14[%c0_31, %c0_32, %c0_33], %56 {strides = array<i32>} : memref<2x16x128xbf16, #tpu.memory_space<vmem>>, vector<1x16x128xbf16>,
    %c0_34 = arith.constant 0 : index
    %c0_35 = arith.constant 0 : index
    %c0_36 = arith.constant 0 : index
    %57 = vector.load %arg15[%c0_34, %c0_35, %c0_36] : memref<2x16x128xf32, #tpu.memory_space<vmem>>, vector<1x16x128xf32>
    %58 = vector.shape_cast %57 : vector<1x16x128xf32> to vector<16x128xf32>
    %59 = vector.shape_cast %50 : vector<16x128xf32> to vector<1x16x128xf32>
    tpu.vector_store %arg15[%c0_34, %c0_35, %c0_36], %59 {strides = array<i32>} : memref<2x16x128xf32, #tpu.memory_space<vmem>>, vector<1x16x128xf32>,
    %60 = arith.index_cast %c0_i32_10 : i32 to index
    %c0_37 = arith.constant 0 : index
    %c0_38 = arith.constant 0 : index
    %61 = vector.load %arg12[%60, %c0_37, %c0_38] : memref<4x16x128xbf16, #tpu.memory_space<vmem>>, vector<1x16x128xbf16>
    %62 = vector.shape_cast %61 : vector<1x16x128xbf16> to vector<16x128xbf16>
    %63 = vector.shape_cast %53 : vector<16x128xbf16> to vector<1x16x128xbf16>
    tpu.vector_store %arg12[%60, %c0_37, %c0_38], %63 {strides = array<i32>} : memref<4x16x128xbf16, #tpu.memory_space<vmem>>, vector<1x16x128xbf16>,
    %c1_i32 = arith.constant 1 : i32
    %c0_39 = arith.constant 0 : index
    %c0_40 = arith.constant 0 : index
    %c0_41 = arith.constant 0 : index
    %64 = vector.load %arg14[%c0_39, %c0_40, %c0_41] : memref<2x16x128xbf16, #tpu.memory_space<vmem>>, vector<1x16x128xbf16>
    %65 = vector.shape_cast %64 : vector<1x16x128xbf16> to vector<16x128xbf16>
    %c0_42 = arith.constant 0 : index
    %c0_43 = arith.constant 0 : index
    %c0_44 = arith.constant 0 : index
    %66 = vector.load %arg15[%c0_42, %c0_43, %c0_44] : memref<2x16x128xf32, #tpu.memory_space<vmem>>, vector<1x16x128xf32>
    %67 = vector.shape_cast %66 : vector<1x16x128xf32> to vector<16x128xf32>
    %68 = arith.index_cast %c1_i32 : i32 to index
    %c0_45 = arith.constant 0 : index
    %c0_46 = arith.constant 0 : index
    %69 = vector.load %arg13[%68, %c0_45, %c0_46] : memref<4x16x512xf32, #tpu.memory_space<vmem>>, vector<1x16x512xf32>
    %70 = vector.shape_cast %69 : vector<1x16x512xf32> to vector<16x512xf32>
    %c0_47 = arith.constant 0 : index
    %c0_48 = arith.constant 0 : index
    %71 = vector.load %arg4[%c0_47, %c0_48] : memref<128x512xbf16, #tpu.memory_space<vmem>>, vector<128x512xbf16>
    %cst_49 = arith.constant dense<0.000000e+00> : vector<16x512xf32>
    %72 = tpu.matmul %65, %71, %cst_49 {dimension_numbers = #tpu.dot_dimension_numbers<[1], [0], [0], [1], [0, 0, 1, 1], [], []>} : vector<16x128xbf16>, vector<128x512xbf16>, vector<16x512xf32> -> vector<16x512xf32>
    %73 = arith.addf %70, %72 : vector<16x512xf32>
    %74 = vector.extract_strided_slice %73 {offsets = [0, 0], sizes = [16, 128], strides = [1, 1]} : vector<16x512xf32> to vector<16x128xf32>
    %cst_50 = arith.constant 5.000000e-01 : f32
    %75 = vector.broadcast %cst_50 : f32 to vector<16x128xf32>
    %76 = arith.mulf %75, %74 : vector<16x128xf32>
    %77 = math.tanh %76 : vector<16x128xf32>
    %cst_51 = arith.constant 5.000000e-01 : f32
    %78 = vector.broadcast %cst_51 : f32 to vector<16x128xf32>
    %79 = arith.mulf %78, %77 : vector<16x128xf32>
    %cst_52 = arith.constant 5.000000e-01 : f32
    %80 = vector.broadcast %cst_52 : f32 to vector<16x128xf32>
    %81 = arith.addf %79, %80 : vector<16x128xf32>
    %82 = vector.extract_strided_slice %73 {offsets = [0, 128], sizes = [16, 128], strides = [1, 1]} : vector<16x512xf32> to vector<16x128xf32>
    %cst_53 = arith.constant 5.000000e-01 : f32
    %83 = vector.broadcast %cst_53 : f32 to vector<16x128xf32>
    %84 = arith.mulf %83, %82 : vector<16x128xf32>
    %85 = math.tanh %84 : vector<16x128xf32>
    %cst_54 = arith.constant 5.000000e-01 : f32
    %86 = vector.broadcast %cst_54 : f32 to vector<16x128xf32>
    %87 = arith.mulf %86, %85 : vector<16x128xf32>
    %cst_55 = arith.constant 5.000000e-01 : f32
    %88 = vector.broadcast %cst_55 : f32 to vector<16x128xf32>
    %89 = arith.addf %87, %88 : vector<16x128xf32>
    %90 = vector.extract_strided_slice %73 {offsets = [0, 256], sizes = [16, 128], strides = [1, 1]} : vector<16x512xf32> to vector<16x128xf32>
    %91 = math.tanh %90 : vector<16x128xf32>
    %92 = vector.extract_strided_slice %73 {offsets = [0, 384], sizes = [16, 128], strides = [1, 1]} : vector<16x512xf32> to vector<16x128xf32>
    %cst_56 = arith.constant 5.000000e-01 : f32
    %93 = vector.broadcast %cst_56 : f32 to vector<16x128xf32>
    %94 = arith.mulf %93, %92 : vector<16x128xf32>
    %95 = math.tanh %94 : vector<16x128xf32>
    %cst_57 = arith.constant 5.000000e-01 : f32
    %96 = vector.broadcast %cst_57 : f32 to vector<16x128xf32>
    %97 = arith.mulf %96, %95 : vector<16x128xf32>
    %cst_58 = arith.constant 5.000000e-01 : f32
    %98 = vector.broadcast %cst_58 : f32 to vector<16x128xf32>
    %99 = arith.addf %97, %98 : vector<16x128xf32>
    %100 = arith.mulf %89, %67 : vector<16x128xf32>
    %101 = arith.mulf %81, %91 : vector<16x128xf32>
    %102 = arith.addf %100, %101 : vector<16x128xf32>
    %103 = math.tanh %102 : vector<16x128xf32>
    %104 = arith.mulf %99, %103 : vector<16x128xf32>
    %105 = arith.truncf %104 : vector<16x128xf32> to vector<16x128xbf16>
    %c0_59 = arith.constant 0 : index
    %c0_60 = arith.constant 0 : index
    %c0_61 = arith.constant 0 : index
    %106 = vector.load %arg14[%c0_59, %c0_60, %c0_61] : memref<2x16x128xbf16, #tpu.memory_space<vmem>>, vector<1x16x128xbf16>
    %107 = vector.shape_cast %106 : vector<1x16x128xbf16> to vector<16x128xbf16>
    %108 = vector.shape_cast %105 : vector<16x128xbf16> to vector<1x16x128xbf16>
    tpu.vector_store %arg14[%c0_59, %c0_60, %c0_61], %108 {strides = array<i32>} : memref<2x16x128xbf16, #tpu.memory_space<vmem>>, vector<1x16x128xbf16>,
    %c0_62 = arith.constant 0 : index
    %c0_63 = arith.constant 0 : index
    %c0_64 = arith.constant 0 : index
    %109 = vector.load %arg15[%c0_62, %c0_63, %c0_64] : memref<2x16x128xf32, #tpu.memory_space<vmem>>, vector<1x16x128xf32>
    %110 = vector.shape_cast %109 : vector<1x16x128xf32> to vector<16x128xf32>
    %111 = vector.shape_cast %102 : vector<16x128xf32> to vector<1x16x128xf32>
    tpu.vector_store %arg15[%c0_62, %c0_63, %c0_64], %111 {strides = array<i32>} : memref<2x16x128xf32, #tpu.memory_space<vmem>>, vector<1x16x128xf32>,
    %112 = arith.index_cast %c1_i32 : i32 to index
    %c0_65 = arith.constant 0 : index
    %c0_66 = arith.constant 0 : index
    %113 = vector.load %arg12[%112, %c0_65, %c0_66] : memref<4x16x128xbf16, #tpu.memory_space<vmem>>, vector<1x16x128xbf16>
    %114 = vector.shape_cast %113 : vector<1x16x128xbf16> to vector<16x128xbf16>
    %115 = vector.shape_cast %105 : vector<16x128xbf16> to vector<1x16x128xbf16>
    tpu.vector_store %arg12[%112, %c0_65, %c0_66], %115 {strides = array<i32>} : memref<4x16x128xbf16, #tpu.memory_space<vmem>>, vector<1x16x128xbf16>,
    %c2_i32 = arith.constant 2 : i32
    %c0_67 = arith.constant 0 : index
    %c0_68 = arith.constant 0 : index
    %c0_69 = arith.constant 0 : index
    %116 = vector.load %arg14[%c0_67, %c0_68, %c0_69] : memref<2x16x128xbf16, #tpu.memory_space<vmem>>, vector<1x16x128xbf16>
    %117 = vector.shape_cast %116 : vector<1x16x128xbf16> to vector<16x128xbf16>
    %c0_70 = arith.constant 0 : index
    %c0_71 = arith.constant 0 : index
    %c0_72 = arith.constant 0 : index
    %118 = vector.load %arg15[%c0_70, %c0_71, %c0_72] : memref<2x16x128xf32, #tpu.memory_space<vmem>>, vector<1x16x128xf32>
    %119 = vector.shape_cast %118 : vector<1x16x128xf32> to vector<16x128xf32>
    %120 = arith.index_cast %c2_i32 : i32 to index
    %c0_73 = arith.constant 0 : index
    %c0_74 = arith.constant 0 : index
    %121 = vector.load %arg13[%120, %c0_73, %c0_74] : memref<4x16x512xf32, #tpu.memory_space<vmem>>, vector<1x16x512xf32>
    %122 = vector.shape_cast %121 : vector<1x16x512xf32> to vector<16x512xf32>
    %c0_75 = arith.constant 0 : index
    %c0_76 = arith.constant 0 : index
    %123 = vector.load %arg4[%c0_75, %c0_76] : memref<128x512xbf16, #tpu.memory_space<vmem>>, vector<128x512xbf16>
    %cst_77 = arith.constant dense<0.000000e+00> : vector<16x512xf32>
    %124 = tpu.matmul %117, %123, %cst_77 {dimension_numbers = #tpu.dot_dimension_numbers<[1], [0], [0], [1], [0, 0, 1, 1], [], []>} : vector<16x128xbf16>, vector<128x512xbf16>, vector<16x512xf32> -> vector<16x512xf32>
    %125 = arith.addf %122, %124 : vector<16x512xf32>
    %126 = vector.extract_strided_slice %125 {offsets = [0, 0], sizes = [16, 128], strides = [1, 1]} : vector<16x512xf32> to vector<16x128xf32>
    %cst_78 = arith.constant 5.000000e-01 : f32
    %127 = vector.broadcast %cst_78 : f32 to vector<16x128xf32>
    %128 = arith.mulf %127, %126 : vector<16x128xf32>
    %129 = math.tanh %128 : vector<16x128xf32>
    %cst_79 = arith.constant 5.000000e-01 : f32
    %130 = vector.broadcast %cst_79 : f32 to vector<16x128xf32>
    %131 = arith.mulf %130, %129 : vector<16x128xf32>
    %cst_80 = arith.constant 5.000000e-01 : f32
    %132 = vector.broadcast %cst_80 : f32 to vector<16x128xf32>
    %133 = arith.addf %131, %132 : vector<16x128xf32>
    %134 = vector.extract_strided_slice %125 {offsets = [0, 128], sizes = [16, 128], strides = [1, 1]} : vector<16x512xf32> to vector<16x128xf32>
    %cst_81 = arith.constant 5.000000e-01 : f32
    %135 = vector.broadcast %cst_81 : f32 to vector<16x128xf32>
    %136 = arith.mulf %135, %134 : vector<16x128xf32>
    %137 = math.tanh %136 : vector<16x128xf32>
    %cst_82 = arith.constant 5.000000e-01 : f32
    %138 = vector.broadcast %cst_82 : f32 to vector<16x128xf32>
    %139 = arith.mulf %138, %137 : vector<16x128xf32>
    %cst_83 = arith.constant 5.000000e-01 : f32
    %140 = vector.broadcast %cst_83 : f32 to vector<16x128xf32>
    %141 = arith.addf %139, %140 : vector<16x128xf32>
    %142 = vector.extract_strided_slice %125 {offsets = [0, 256], sizes = [16, 128], strides = [1, 1]} : vector<16x512xf32> to vector<16x128xf32>
    %143 = math.tanh %142 : vector<16x128xf32>
    %144 = vector.extract_strided_slice %125 {offsets = [0, 384], sizes = [16, 128], strides = [1, 1]} : vector<16x512xf32> to vector<16x128xf32>
    %cst_84 = arith.constant 5.000000e-01 : f32
    %145 = vector.broadcast %cst_84 : f32 to vector<16x128xf32>
    %146 = arith.mulf %145, %144 : vector<16x128xf32>
    %147 = math.tanh %146 : vector<16x128xf32>
    %cst_85 = arith.constant 5.000000e-01 : f32
    %148 = vector.broadcast %cst_85 : f32 to vector<16x128xf32>
    %149 = arith.mulf %148, %147 : vector<16x128xf32>
    %cst_86 = arith.constant 5.000000e-01 : f32
    %150 = vector.broadcast %cst_86 : f32 to vector<16x128xf32>
    %151 = arith.addf %149, %150 : vector<16x128xf32>
    %152 = arith.mulf %141, %119 : vector<16x128xf32>
    %153 = arith.mulf %133, %143 : vector<16x128xf32>
    %154 = arith.addf %152, %153 : vector<16x128xf32>
    %155 = math.tanh %154 : vector<16x128xf32>
    %156 = arith.mulf %151, %155 : vector<16x128xf32>
    %157 = arith.truncf %156 : vector<16x128xf32> to vector<16x128xbf16>
    %c0_87 = arith.constant 0 : index
    %c0_88 = arith.constant 0 : index
    %c0_89 = arith.constant 0 : index
    %158 = vector.load %arg14[%c0_87, %c0_88, %c0_89] : memref<2x16x128xbf16, #tpu.memory_space<vmem>>, vector<1x16x128xbf16>
    %159 = vector.shape_cast %158 : vector<1x16x128xbf16> to vector<16x128xbf16>
    %160 = vector.shape_cast %157 : vector<16x128xbf16> to vector<1x16x128xbf16>
    tpu.vector_store %arg14[%c0_87, %c0_88, %c0_89], %160 {strides = array<i32>} : memref<2x16x128xbf16, #tpu.memory_space<vmem>>, vector<1x16x128xbf16>,
    %c0_90 = arith.constant 0 : index
    %c0_91 = arith.constant 0 : index
    %c0_92 = arith.constant 0 : index
    %161 = vector.load %arg15[%c0_90, %c0_91, %c0_92] : memref<2x16x128xf32, #tpu.memory_space<vmem>>, vector<1x16x128xf32>
    %162 = vector.shape_cast %161 : vector<1x16x128xf32> to vector<16x128xf32>
    %163 = vector.shape_cast %154 : vector<16x128xf32> to vector<1x16x128xf32>
    tpu.vector_store %arg15[%c0_90, %c0_91, %c0_92], %163 {strides = array<i32>} : memref<2x16x128xf32, #tpu.memory_space<vmem>>, vector<1x16x128xf32>,
    %164 = arith.index_cast %c2_i32 : i32 to index
    %c0_93 = arith.constant 0 : index
    %c0_94 = arith.constant 0 : index
    %165 = vector.load %arg12[%164, %c0_93, %c0_94] : memref<4x16x128xbf16, #tpu.memory_space<vmem>>, vector<1x16x128xbf16>
    %166 = vector.shape_cast %165 : vector<1x16x128xbf16> to vector<16x128xbf16>
    %167 = vector.shape_cast %157 : vector<16x128xbf16> to vector<1x16x128xbf16>
    tpu.vector_store %arg12[%164, %c0_93, %c0_94], %167 {strides = array<i32>} : memref<4x16x128xbf16, #tpu.memory_space<vmem>>, vector<1x16x128xbf16>,
    %c3_i32 = arith.constant 3 : i32
    %c0_95 = arith.constant 0 : index
    %c0_96 = arith.constant 0 : index
    %c0_97 = arith.constant 0 : index
    %168 = vector.load %arg14[%c0_95, %c0_96, %c0_97] : memref<2x16x128xbf16, #tpu.memory_space<vmem>>, vector<1x16x128xbf16>
    %169 = vector.shape_cast %168 : vector<1x16x128xbf16> to vector<16x128xbf16>
    %c0_98 = arith.constant 0 : index
    %c0_99 = arith.constant 0 : index
    %c0_100 = arith.constant 0 : index
    %170 = vector.load %arg15[%c0_98, %c0_99, %c0_100] : memref<2x16x128xf32, #tpu.memory_space<vmem>>, vector<1x16x128xf32>
    %171 = vector.shape_cast %170 : vector<1x16x128xf32> to vector<16x128xf32>
    %172 = arith.index_cast %c3_i32 : i32 to index
    %c0_101 = arith.constant 0 : index
    %c0_102 = arith.constant 0 : index
    %173 = vector.load %arg13[%172, %c0_101, %c0_102] : memref<4x16x512xf32, #tpu.memory_space<vmem>>, vector<1x16x512xf32>
    %174 = vector.shape_cast %173 : vector<1x16x512xf32> to vector<16x512xf32>
    %c0_103 = arith.constant 0 : index
    %c0_104 = arith.constant 0 : index
    %175 = vector.load %arg4[%c0_103, %c0_104] : memref<128x512xbf16, #tpu.memory_space<vmem>>, vector<128x512xbf16>
    %cst_105 = arith.constant dense<0.000000e+00> : vector<16x512xf32>
    %176 = tpu.matmul %169, %175, %cst_105 {dimension_numbers = #tpu.dot_dimension_numbers<[1], [0], [0], [1], [0, 0, 1, 1], [], []>} : vector<16x128xbf16>, vector<128x512xbf16>, vector<16x512xf32> -> vector<16x512xf32>
    %177 = arith.addf %174, %176 : vector<16x512xf32>
    %178 = vector.extract_strided_slice %177 {offsets = [0, 0], sizes = [16, 128], strides = [1, 1]} : vector<16x512xf32> to vector<16x128xf32>
    %cst_106 = arith.constant 5.000000e-01 : f32
    %179 = vector.broadcast %cst_106 : f32 to vector<16x128xf32>
    %180 = arith.mulf %179, %178 : vector<16x128xf32>
    %181 = math.tanh %180 : vector<16x128xf32>
    %cst_107 = arith.constant 5.000000e-01 : f32
    %182 = vector.broadcast %cst_107 : f32 to vector<16x128xf32>
    %183 = arith.mulf %182, %181 : vector<16x128xf32>
    %cst_108 = arith.constant 5.000000e-01 : f32
    %184 = vector.broadcast %cst_108 : f32 to vector<16x128xf32>
    %185 = arith.addf %183, %184 : vector<16x128xf32>
    %186 = vector.extract_strided_slice %177 {offsets = [0, 128], sizes = [16, 128], strides = [1, 1]} : vector<16x512xf32> to vector<16x128xf32>
    %cst_109 = arith.constant 5.000000e-01 : f32
    %187 = vector.broadcast %cst_109 : f32 to vector<16x128xf32>
    %188 = arith.mulf %187, %186 : vector<16x128xf32>
    %189 = math.tanh %188 : vector<16x128xf32>
    %cst_110 = arith.constant 5.000000e-01 : f32
    %190 = vector.broadcast %cst_110 : f32 to vector<16x128xf32>
    %191 = arith.mulf %190, %189 : vector<16x128xf32>
    %cst_111 = arith.constant 5.000000e-01 : f32
    %192 = vector.broadcast %cst_111 : f32 to vector<16x128xf32>
    %193 = arith.addf %191, %192 : vector<16x128xf32>
    %194 = vector.extract_strided_slice %177 {offsets = [0, 256], sizes = [16, 128], strides = [1, 1]} : vector<16x512xf32> to vector<16x128xf32>
    %195 = math.tanh %194 : vector<16x128xf32>
    %196 = vector.extract_strided_slice %177 {offsets = [0, 384], sizes = [16, 128], strides = [1, 1]} : vector<16x512xf32> to vector<16x128xf32>
    %cst_112 = arith.constant 5.000000e-01 : f32
    %197 = vector.broadcast %cst_112 : f32 to vector<16x128xf32>
    %198 = arith.mulf %197, %196 : vector<16x128xf32>
    %199 = math.tanh %198 : vector<16x128xf32>
    %cst_113 = arith.constant 5.000000e-01 : f32
    %200 = vector.broadcast %cst_113 : f32 to vector<16x128xf32>
    %201 = arith.mulf %200, %199 : vector<16x128xf32>
    %cst_114 = arith.constant 5.000000e-01 : f32
    %202 = vector.broadcast %cst_114 : f32 to vector<16x128xf32>
    %203 = arith.addf %201, %202 : vector<16x128xf32>
    %204 = arith.mulf %193, %171 : vector<16x128xf32>
    %205 = arith.mulf %185, %195 : vector<16x128xf32>
    %206 = arith.addf %204, %205 : vector<16x128xf32>
    %207 = math.tanh %206 : vector<16x128xf32>
    %208 = arith.mulf %203, %207 : vector<16x128xf32>
    %209 = arith.truncf %208 : vector<16x128xf32> to vector<16x128xbf16>
    %c0_115 = arith.constant 0 : index
    %c0_116 = arith.constant 0 : index
    %c0_117 = arith.constant 0 : index
    %210 = vector.load %arg14[%c0_115, %c0_116, %c0_117] : memref<2x16x128xbf16, #tpu.memory_space<vmem>>, vector<1x16x128xbf16>
    %211 = vector.shape_cast %210 : vector<1x16x128xbf16> to vector<16x128xbf16>
    %212 = vector.shape_cast %209 : vector<16x128xbf16> to vector<1x16x128xbf16>
    tpu.vector_store %arg14[%c0_115, %c0_116, %c0_117], %212 {strides = array<i32>} : memref<2x16x128xbf16, #tpu.memory_space<vmem>>, vector<1x16x128xbf16>,
    %c0_118 = arith.constant 0 : index
    %c0_119 = arith.constant 0 : index
    %c0_120 = arith.constant 0 : index
    %213 = vector.load %arg15[%c0_118, %c0_119, %c0_120] : memref<2x16x128xf32, #tpu.memory_space<vmem>>, vector<1x16x128xf32>
    %214 = vector.shape_cast %213 : vector<1x16x128xf32> to vector<16x128xf32>
    %215 = vector.shape_cast %206 : vector<16x128xf32> to vector<1x16x128xf32>
    tpu.vector_store %arg15[%c0_118, %c0_119, %c0_120], %215 {strides = array<i32>} : memref<2x16x128xf32, #tpu.memory_space<vmem>>, vector<1x16x128xf32>,
    %216 = arith.index_cast %c3_i32 : i32 to index
    %c0_121 = arith.constant 0 : index
    %c0_122 = arith.constant 0 : index
    %217 = vector.load %arg12[%216, %c0_121, %c0_122] : memref<4x16x128xbf16, #tpu.memory_space<vmem>>, vector<1x16x128xbf16>
    %218 = vector.shape_cast %217 : vector<1x16x128xbf16> to vector<16x128xbf16>
    %219 = vector.shape_cast %209 : vector<16x128xbf16> to vector<1x16x128xbf16>
    tpu.vector_store %arg12[%216, %c0_121, %c0_122], %219 {strides = array<i32>} : memref<4x16x128xbf16, #tpu.memory_space<vmem>>, vector<1x16x128xbf16>,
    %c4_i32 = arith.constant 4 : i32
    %c0_123 = arith.constant 0 : index
    %c0_124 = arith.constant 0 : index
    %c0_125 = arith.constant 0 : index
    %220 = vector.load %arg12[%c0_123, %c0_124, %c0_125] : memref<4x16x128xbf16, #tpu.memory_space<vmem>>, vector<4x16x128xbf16>
    %221 = vector.shape_cast %220 : vector<4x16x128xbf16> to vector<64x128xbf16>
    %c0_126 = arith.constant 0 : index
    %c0_127 = arith.constant 0 : index
    %222 = vector.load %arg6[%c0_126, %c0_127] : memref<128x512xbf16, #tpu.memory_space<vmem>>, vector<128x512xbf16>
    %cst_128 = arith.constant dense<0.000000e+00> : vector<64x512xf32>
    %223 = tpu.matmul %221, %222, %cst_128 {dimension_numbers = #tpu.dot_dimension_numbers<[1], [0], [0], [1], [0, 0, 1, 1], [], []>} : vector<64x128xbf16>, vector<128x512xbf16>, vector<64x512xf32> -> vector<64x512xf32>
    %c0_129 = arith.constant 0 : index
    %c0_130 = arith.constant 0 : index
    %224 = vector.load %arg8[%c0_129, %c0_130] : memref<1x512xf32, #tpu.memory_space<vmem>>, vector<1x512xf32>
    %225 = vector.broadcast %224 : vector<1x512xf32> to vector<64x512xf32>
    %226 = arith.addf %223, %225 : vector<64x512xf32>
    %227 = vector.shape_cast %226 : vector<64x512xf32> to vector<4x16x512xf32>
    %c0_131 = arith.constant 0 : index
    %c0_132 = arith.constant 0 : index
    %c0_133 = arith.constant 0 : index
    %228 = vector.load %arg13[%c0_131, %c0_132, %c0_133] : memref<4x16x512xf32, #tpu.memory_space<vmem>>, vector<4x16x512xf32>
    tpu.vector_store %arg13[%c0_131, %c0_132, %c0_133], %227 {strides = array<i32>} : memref<4x16x512xf32, #tpu.memory_space<vmem>>, vector<4x16x512xf32>,
    %c0_i32_134 = arith.constant 0 : i32
    %c1 = arith.constant 1 : index
    %c0_135 = arith.constant 0 : index
    %c0_136 = arith.constant 0 : index
    %229 = vector.load %arg14[%c1, %c0_135, %c0_136] : memref<2x16x128xbf16, #tpu.memory_space<vmem>>, vector<1x16x128xbf16>
    %230 = vector.shape_cast %229 : vector<1x16x128xbf16> to vector<16x128xbf16>
    %c1_137 = arith.constant 1 : index
    %c0_138 = arith.constant 0 : index
    %c0_139 = arith.constant 0 : index
    %231 = vector.load %arg15[%c1_137, %c0_138, %c0_139] : memref<2x16x128xf32, #tpu.memory_space<vmem>>, vector<1x16x128xf32>
    %232 = vector.shape_cast %231 : vector<1x16x128xf32> to vector<16x128xf32>
    %233 = arith.index_cast %c0_i32_134 : i32 to index
    %c0_140 = arith.constant 0 : index
    %c0_141 = arith.constant 0 : index
    %234 = vector.load %arg13[%233, %c0_140, %c0_141] : memref<4x16x512xf32, #tpu.memory_space<vmem>>, vector<1x16x512xf32>
    %235 = vector.shape_cast %234 : vector<1x16x512xf32> to vector<16x512xf32>
    %c0_142 = arith.constant 0 : index
    %c0_143 = arith.constant 0 : index
    %236 = vector.load %arg7[%c0_142, %c0_143] : memref<128x512xbf16, #tpu.memory_space<vmem>>, vector<128x512xbf16>
    %cst_144 = arith.constant dense<0.000000e+00> : vector<16x512xf32>
    %237 = tpu.matmul %230, %236, %cst_144 {dimension_numbers = #tpu.dot_dimension_numbers<[1], [0], [0], [1], [0, 0, 1, 1], [], []>} : vector<16x128xbf16>, vector<128x512xbf16>, vector<16x512xf32> -> vector<16x512xf32>
    %238 = arith.addf %235, %237 : vector<16x512xf32>
    %239 = vector.extract_strided_slice %238 {offsets = [0, 0], sizes = [16, 128], strides = [1, 1]} : vector<16x512xf32> to vector<16x128xf32>
    %cst_145 = arith.constant 5.000000e-01 : f32
    %240 = vector.broadcast %cst_145 : f32 to vector<16x128xf32>
    %241 = arith.mulf %240, %239 : vector<16x128xf32>
    %242 = math.tanh %241 : vector<16x128xf32>
    %cst_146 = arith.constant 5.000000e-01 : f32
    %243 = vector.broadcast %cst_146 : f32 to vector<16x128xf32>
    %244 = arith.mulf %243, %242 : vector<16x128xf32>
    %cst_147 = arith.constant 5.000000e-01 : f32
    %245 = vector.broadcast %cst_147 : f32 to vector<16x128xf32>
    %246 = arith.addf %244, %245 : vector<16x128xf32>
    %247 = vector.extract_strided_slice %238 {offsets = [0, 128], sizes = [16, 128], strides = [1, 1]} : vector<16x512xf32> to vector<16x128xf32>
    %cst_148 = arith.constant 5.000000e-01 : f32
    %248 = vector.broadcast %cst_148 : f32 to vector<16x128xf32>
    %249 = arith.mulf %248, %247 : vector<16x128xf32>
    %250 = math.tanh %249 : vector<16x128xf32>
    %cst_149 = arith.constant 5.000000e-01 : f32
    %251 = vector.broadcast %cst_149 : f32 to vector<16x128xf32>
    %252 = arith.mulf %251, %250 : vector<16x128xf32>
    %cst_150 = arith.constant 5.000000e-01 : f32
    %253 = vector.broadcast %cst_150 : f32 to vector<16x128xf32>
    %254 = arith.addf %252, %253 : vector<16x128xf32>
    %255 = vector.extract_strided_slice %238 {offsets = [0, 256], sizes = [16, 128], strides = [1, 1]} : vector<16x512xf32> to vector<16x128xf32>
    %256 = math.tanh %255 : vector<16x128xf32>
    %257 = vector.extract_strided_slice %238 {offsets = [0, 384], sizes = [16, 128], strides = [1, 1]} : vector<16x512xf32> to vector<16x128xf32>
    %cst_151 = arith.constant 5.000000e-01 : f32
    %258 = vector.broadcast %cst_151 : f32 to vector<16x128xf32>
    %259 = arith.mulf %258, %257 : vector<16x128xf32>
    %260 = math.tanh %259 : vector<16x128xf32>
    %cst_152 = arith.constant 5.000000e-01 : f32
    %261 = vector.broadcast %cst_152 : f32 to vector<16x128xf32>
    %262 = arith.mulf %261, %260 : vector<16x128xf32>
    %cst_153 = arith.constant 5.000000e-01 : f32
    %263 = vector.broadcast %cst_153 : f32 to vector<16x128xf32>
    %264 = arith.addf %262, %263 : vector<16x128xf32>
    %265 = arith.mulf %254, %232 : vector<16x128xf32>
    %266 = arith.mulf %246, %256 : vector<16x128xf32>
    %267 = arith.addf %265, %266 : vector<16x128xf32>
    %268 = math.tanh %267 : vector<16x128xf32>
    %269 = arith.mulf %264, %268 : vector<16x128xf32>
    %270 = arith.truncf %269 : vector<16x128xf32> to vector<16x128xbf16>
    %c1_154 = arith.constant 1 : index
    %c0_155 = arith.constant 0 : index
    %c0_156 = arith.constant 0 : index
    %271 = vector.load %arg14[%c1_154, %c0_155, %c0_156] : memref<2x16x128xbf16, #tpu.memory_space<vmem>>, vector<1x16x128xbf16>
    %272 = vector.shape_cast %271 : vector<1x16x128xbf16> to vector<16x128xbf16>
    %273 = vector.shape_cast %270 : vector<16x128xbf16> to vector<1x16x128xbf16>
    tpu.vector_store %arg14[%c1_154, %c0_155, %c0_156], %273 {strides = array<i32>} : memref<2x16x128xbf16, #tpu.memory_space<vmem>>, vector<1x16x128xbf16>,
    %c1_157 = arith.constant 1 : index
    %c0_158 = arith.constant 0 : index
    %c0_159 = arith.constant 0 : index
    %274 = vector.load %arg15[%c1_157, %c0_158, %c0_159] : memref<2x16x128xf32, #tpu.memory_space<vmem>>, vector<1x16x128xf32>
    %275 = vector.shape_cast %274 : vector<1x16x128xf32> to vector<16x128xf32>
    %276 = vector.shape_cast %267 : vector<16x128xf32> to vector<1x16x128xf32>
    tpu.vector_store %arg15[%c1_157, %c0_158, %c0_159], %276 {strides = array<i32>} : memref<2x16x128xf32, #tpu.memory_space<vmem>>, vector<1x16x128xf32>,
    %c1_i32_160 = arith.constant 1 : i32
    %c1_161 = arith.constant 1 : index
    %c0_162 = arith.constant 0 : index
    %c0_163 = arith.constant 0 : index
    %277 = vector.load %arg14[%c1_161, %c0_162, %c0_163] : memref<2x16x128xbf16, #tpu.memory_space<vmem>>, vector<1x16x128xbf16>
    %278 = vector.shape_cast %277 : vector<1x16x128xbf16> to vector<16x128xbf16>
    %c1_164 = arith.constant 1 : index
    %c0_165 = arith.constant 0 : index
    %c0_166 = arith.constant 0 : index
    %279 = vector.load %arg15[%c1_164, %c0_165, %c0_166] : memref<2x16x128xf32, #tpu.memory_space<vmem>>, vector<1x16x128xf32>
    %280 = vector.shape_cast %279 : vector<1x16x128xf32> to vector<16x128xf32>
    %281 = arith.index_cast %c1_i32_160 : i32 to index
    %c0_167 = arith.constant 0 : index
    %c0_168 = arith.constant 0 : index
    %282 = vector.load %arg13[%281, %c0_167, %c0_168] : memref<4x16x512xf32, #tpu.memory_space<vmem>>, vector<1x16x512xf32>
    %283 = vector.shape_cast %282 : vector<1x16x512xf32> to vector<16x512xf32>
    %c0_169 = arith.constant 0 : index
    %c0_170 = arith.constant 0 : index
    %284 = vector.load %arg7[%c0_169, %c0_170] : memref<128x512xbf16, #tpu.memory_space<vmem>>, vector<128x512xbf16>
    %cst_171 = arith.constant dense<0.000000e+00> : vector<16x512xf32>
    %285 = tpu.matmul %278, %284, %cst_171 {dimension_numbers = #tpu.dot_dimension_numbers<[1], [0], [0], [1], [0, 0, 1, 1], [], []>} : vector<16x128xbf16>, vector<128x512xbf16>, vector<16x512xf32> -> vector<16x512xf32>
    %286 = arith.addf %283, %285 : vector<16x512xf32>
    %287 = vector.extract_strided_slice %286 {offsets = [0, 0], sizes = [16, 128], strides = [1, 1]} : vector<16x512xf32> to vector<16x128xf32>
    %cst_172 = arith.constant 5.000000e-01 : f32
    %288 = vector.broadcast %cst_172 : f32 to vector<16x128xf32>
    %289 = arith.mulf %288, %287 : vector<16x128xf32>
    %290 = math.tanh %289 : vector<16x128xf32>
    %cst_173 = arith.constant 5.000000e-01 : f32
    %291 = vector.broadcast %cst_173 : f32 to vector<16x128xf32>
    %292 = arith.mulf %291, %290 : vector<16x128xf32>
    %cst_174 = arith.constant 5.000000e-01 : f32
    %293 = vector.broadcast %cst_174 : f32 to vector<16x128xf32>
    %294 = arith.addf %292, %293 : vector<16x128xf32>
    %295 = vector.extract_strided_slice %286 {offsets = [0, 128], sizes = [16, 128], strides = [1, 1]} : vector<16x512xf32> to vector<16x128xf32>
    %cst_175 = arith.constant 5.000000e-01 : f32
    %296 = vector.broadcast %cst_175 : f32 to vector<16x128xf32>
    %297 = arith.mulf %296, %295 : vector<16x128xf32>
    %298 = math.tanh %297 : vector<16x128xf32>
    %cst_176 = arith.constant 5.000000e-01 : f32
    %299 = vector.broadcast %cst_176 : f32 to vector<16x128xf32>
    %300 = arith.mulf %299, %298 : vector<16x128xf32>
    %cst_177 = arith.constant 5.000000e-01 : f32
    %301 = vector.broadcast %cst_177 : f32 to vector<16x128xf32>
    %302 = arith.addf %300, %301 : vector<16x128xf32>
    %303 = vector.extract_strided_slice %286 {offsets = [0, 256], sizes = [16, 128], strides = [1, 1]} : vector<16x512xf32> to vector<16x128xf32>
    %304 = math.tanh %303 : vector<16x128xf32>
    %305 = vector.extract_strided_slice %286 {offsets = [0, 384], sizes = [16, 128], strides = [1, 1]} : vector<16x512xf32> to vector<16x128xf32>
    %cst_178 = arith.constant 5.000000e-01 : f32
    %306 = vector.broadcast %cst_178 : f32 to vector<16x128xf32>
    %307 = arith.mulf %306, %305 : vector<16x128xf32>
    %308 = math.tanh %307 : vector<16x128xf32>
    %cst_179 = arith.constant 5.000000e-01 : f32
    %309 = vector.broadcast %cst_179 : f32 to vector<16x128xf32>
    %310 = arith.mulf %309, %308 : vector<16x128xf32>
    %cst_180 = arith.constant 5.000000e-01 : f32
    %311 = vector.broadcast %cst_180 : f32 to vector<16x128xf32>
    %312 = arith.addf %310, %311 : vector<16x128xf32>
    %313 = arith.mulf %302, %280 : vector<16x128xf32>
    %314 = arith.mulf %294, %304 : vector<16x128xf32>
    %315 = arith.addf %313, %314 : vector<16x128xf32>
    %316 = math.tanh %315 : vector<16x128xf32>
    %317 = arith.mulf %312, %316 : vector<16x128xf32>
    %318 = arith.truncf %317 : vector<16x128xf32> to vector<16x128xbf16>
    %c1_181 = arith.constant 1 : index
    %c0_182 = arith.constant 0 : index
    %c0_183 = arith.constant 0 : index
    %319 = vector.load %arg14[%c1_181, %c0_182, %c0_183] : memref<2x16x128xbf16, #tpu.memory_space<vmem>>, vector<1x16x128xbf16>
    %320 = vector.shape_cast %319 : vector<1x16x128xbf16> to vector<16x128xbf16>
    %321 = vector.shape_cast %318 : vector<16x128xbf16> to vector<1x16x128xbf16>
    tpu.vector_store %arg14[%c1_181, %c0_182, %c0_183], %321 {strides = array<i32>} : memref<2x16x128xbf16, #tpu.memory_space<vmem>>, vector<1x16x128xbf16>,
    %c1_184 = arith.constant 1 : index
    %c0_185 = arith.constant 0 : index
    %c0_186 = arith.constant 0 : index
    %322 = vector.load %arg15[%c1_184, %c0_185, %c0_186] : memref<2x16x128xf32, #tpu.memory_space<vmem>>, vector<1x16x128xf32>
    %323 = vector.shape_cast %322 : vector<1x16x128xf32> to vector<16x128xf32>
    %324 = vector.shape_cast %315 : vector<16x128xf32> to vector<1x16x128xf32>
    tpu.vector_store %arg15[%c1_184, %c0_185, %c0_186], %324 {strides = array<i32>} : memref<2x16x128xf32, #tpu.memory_space<vmem>>, vector<1x16x128xf32>,
    %c2_i32_187 = arith.constant 2 : i32
    %c1_188 = arith.constant 1 : index
    %c0_189 = arith.constant 0 : index
    %c0_190 = arith.constant 0 : index
    %325 = vector.load %arg14[%c1_188, %c0_189, %c0_190] : memref<2x16x128xbf16, #tpu.memory_space<vmem>>, vector<1x16x128xbf16>
    %326 = vector.shape_cast %325 : vector<1x16x128xbf16> to vector<16x128xbf16>
    %c1_191 = arith.constant 1 : index
    %c0_192 = arith.constant 0 : index
    %c0_193 = arith.constant 0 : index
    %327 = vector.load %arg15[%c1_191, %c0_192, %c0_193] : memref<2x16x128xf32, #tpu.memory_space<vmem>>, vector<1x16x128xf32>
    %328 = vector.shape_cast %327 : vector<1x16x128xf32> to vector<16x128xf32>
    %329 = arith.index_cast %c2_i32_187 : i32 to index
    %c0_194 = arith.constant 0 : index
    %c0_195 = arith.constant 0 : index
    %330 = vector.load %arg13[%329, %c0_194, %c0_195] : memref<4x16x512xf32, #tpu.memory_space<vmem>>, vector<1x16x512xf32>
    %331 = vector.shape_cast %330 : vector<1x16x512xf32> to vector<16x512xf32>
    %c0_196 = arith.constant 0 : index
    %c0_197 = arith.constant 0 : index
    %332 = vector.load %arg7[%c0_196, %c0_197] : memref<128x512xbf16, #tpu.memory_space<vmem>>, vector<128x512xbf16>
    %cst_198 = arith.constant dense<0.000000e+00> : vector<16x512xf32>
    %333 = tpu.matmul %326, %332, %cst_198 {dimension_numbers = #tpu.dot_dimension_numbers<[1], [0], [0], [1], [0, 0, 1, 1], [], []>} : vector<16x128xbf16>, vector<128x512xbf16>, vector<16x512xf32> -> vector<16x512xf32>
    %334 = arith.addf %331, %333 : vector<16x512xf32>
    %335 = vector.extract_strided_slice %334 {offsets = [0, 0], sizes = [16, 128], strides = [1, 1]} : vector<16x512xf32> to vector<16x128xf32>
    %cst_199 = arith.constant 5.000000e-01 : f32
    %336 = vector.broadcast %cst_199 : f32 to vector<16x128xf32>
    %337 = arith.mulf %336, %335 : vector<16x128xf32>
    %338 = math.tanh %337 : vector<16x128xf32>
    %cst_200 = arith.constant 5.000000e-01 : f32
    %339 = vector.broadcast %cst_200 : f32 to vector<16x128xf32>
    %340 = arith.mulf %339, %338 : vector<16x128xf32>
    %cst_201 = arith.constant 5.000000e-01 : f32
    %341 = vector.broadcast %cst_201 : f32 to vector<16x128xf32>
    %342 = arith.addf %340, %341 : vector<16x128xf32>
    %343 = vector.extract_strided_slice %334 {offsets = [0, 128], sizes = [16, 128], strides = [1, 1]} : vector<16x512xf32> to vector<16x128xf32>
    %cst_202 = arith.constant 5.000000e-01 : f32
    %344 = vector.broadcast %cst_202 : f32 to vector<16x128xf32>
    %345 = arith.mulf %344, %343 : vector<16x128xf32>
    %346 = math.tanh %345 : vector<16x128xf32>
    %cst_203 = arith.constant 5.000000e-01 : f32
    %347 = vector.broadcast %cst_203 : f32 to vector<16x128xf32>
    %348 = arith.mulf %347, %346 : vector<16x128xf32>
    %cst_204 = arith.constant 5.000000e-01 : f32
    %349 = vector.broadcast %cst_204 : f32 to vector<16x128xf32>
    %350 = arith.addf %348, %349 : vector<16x128xf32>
    %351 = vector.extract_strided_slice %334 {offsets = [0, 256], sizes = [16, 128], strides = [1, 1]} : vector<16x512xf32> to vector<16x128xf32>
    %352 = math.tanh %351 : vector<16x128xf32>
    %353 = vector.extract_strided_slice %334 {offsets = [0, 384], sizes = [16, 128], strides = [1, 1]} : vector<16x512xf32> to vector<16x128xf32>
    %cst_205 = arith.constant 5.000000e-01 : f32
    %354 = vector.broadcast %cst_205 : f32 to vector<16x128xf32>
    %355 = arith.mulf %354, %353 : vector<16x128xf32>
    %356 = math.tanh %355 : vector<16x128xf32>
    %cst_206 = arith.constant 5.000000e-01 : f32
    %357 = vector.broadcast %cst_206 : f32 to vector<16x128xf32>
    %358 = arith.mulf %357, %356 : vector<16x128xf32>
    %cst_207 = arith.constant 5.000000e-01 : f32
    %359 = vector.broadcast %cst_207 : f32 to vector<16x128xf32>
    %360 = arith.addf %358, %359 : vector<16x128xf32>
    %361 = arith.mulf %350, %328 : vector<16x128xf32>
    %362 = arith.mulf %342, %352 : vector<16x128xf32>
    %363 = arith.addf %361, %362 : vector<16x128xf32>
    %364 = math.tanh %363 : vector<16x128xf32>
    %365 = arith.mulf %360, %364 : vector<16x128xf32>
    %366 = arith.truncf %365 : vector<16x128xf32> to vector<16x128xbf16>
    %c1_208 = arith.constant 1 : index
    %c0_209 = arith.constant 0 : index
    %c0_210 = arith.constant 0 : index
    %367 = vector.load %arg14[%c1_208, %c0_209, %c0_210] : memref<2x16x128xbf16, #tpu.memory_space<vmem>>, vector<1x16x128xbf16>
    %368 = vector.shape_cast %367 : vector<1x16x128xbf16> to vector<16x128xbf16>
    %369 = vector.shape_cast %366 : vector<16x128xbf16> to vector<1x16x128xbf16>
    tpu.vector_store %arg14[%c1_208, %c0_209, %c0_210], %369 {strides = array<i32>} : memref<2x16x128xbf16, #tpu.memory_space<vmem>>, vector<1x16x128xbf16>,
    %c1_211 = arith.constant 1 : index
    %c0_212 = arith.constant 0 : index
    %c0_213 = arith.constant 0 : index
    %370 = vector.load %arg15[%c1_211, %c0_212, %c0_213] : memref<2x16x128xf32, #tpu.memory_space<vmem>>, vector<1x16x128xf32>
    %371 = vector.shape_cast %370 : vector<1x16x128xf32> to vector<16x128xf32>
    %372 = vector.shape_cast %363 : vector<16x128xf32> to vector<1x16x128xf32>
    tpu.vector_store %arg15[%c1_211, %c0_212, %c0_213], %372 {strides = array<i32>} : memref<2x16x128xf32, #tpu.memory_space<vmem>>, vector<1x16x128xf32>,
    %c3_i32_214 = arith.constant 3 : i32
    %c1_215 = arith.constant 1 : index
    %c0_216 = arith.constant 0 : index
    %c0_217 = arith.constant 0 : index
    %373 = vector.load %arg14[%c1_215, %c0_216, %c0_217] : memref<2x16x128xbf16, #tpu.memory_space<vmem>>, vector<1x16x128xbf16>
    %374 = vector.shape_cast %373 : vector<1x16x128xbf16> to vector<16x128xbf16>
    %c1_218 = arith.constant 1 : index
    %c0_219 = arith.constant 0 : index
    %c0_220 = arith.constant 0 : index
    %375 = vector.load %arg15[%c1_218, %c0_219, %c0_220] : memref<2x16x128xf32, #tpu.memory_space<vmem>>, vector<1x16x128xf32>
    %376 = vector.shape_cast %375 : vector<1x16x128xf32> to vector<16x128xf32>
    %377 = arith.index_cast %c3_i32_214 : i32 to index
    %c0_221 = arith.constant 0 : index
    %c0_222 = arith.constant 0 : index
    %378 = vector.load %arg13[%377, %c0_221, %c0_222] : memref<4x16x512xf32, #tpu.memory_space<vmem>>, vector<1x16x512xf32>
    %379 = vector.shape_cast %378 : vector<1x16x512xf32> to vector<16x512xf32>
    %c0_223 = arith.constant 0 : index
    %c0_224 = arith.constant 0 : index
    %380 = vector.load %arg7[%c0_223, %c0_224] : memref<128x512xbf16, #tpu.memory_space<vmem>>, vector<128x512xbf16>
    %cst_225 = arith.constant dense<0.000000e+00> : vector<16x512xf32>
    %381 = tpu.matmul %374, %380, %cst_225 {dimension_numbers = #tpu.dot_dimension_numbers<[1], [0], [0], [1], [0, 0, 1, 1], [], []>} : vector<16x128xbf16>, vector<128x512xbf16>, vector<16x512xf32> -> vector<16x512xf32>
    %382 = arith.addf %379, %381 : vector<16x512xf32>
    %383 = vector.extract_strided_slice %382 {offsets = [0, 0], sizes = [16, 128], strides = [1, 1]} : vector<16x512xf32> to vector<16x128xf32>
    %cst_226 = arith.constant 5.000000e-01 : f32
    %384 = vector.broadcast %cst_226 : f32 to vector<16x128xf32>
    %385 = arith.mulf %384, %383 : vector<16x128xf32>
    %386 = math.tanh %385 : vector<16x128xf32>
    %cst_227 = arith.constant 5.000000e-01 : f32
    %387 = vector.broadcast %cst_227 : f32 to vector<16x128xf32>
    %388 = arith.mulf %387, %386 : vector<16x128xf32>
    %cst_228 = arith.constant 5.000000e-01 : f32
    %389 = vector.broadcast %cst_228 : f32 to vector<16x128xf32>
    %390 = arith.addf %388, %389 : vector<16x128xf32>
    %391 = vector.extract_strided_slice %382 {offsets = [0, 128], sizes = [16, 128], strides = [1, 1]} : vector<16x512xf32> to vector<16x128xf32>
    %cst_229 = arith.constant 5.000000e-01 : f32
    %392 = vector.broadcast %cst_229 : f32 to vector<16x128xf32>
    %393 = arith.mulf %392, %391 : vector<16x128xf32>
    %394 = math.tanh %393 : vector<16x128xf32>
    %cst_230 = arith.constant 5.000000e-01 : f32
    %395 = vector.broadcast %cst_230 : f32 to vector<16x128xf32>
    %396 = arith.mulf %395, %394 : vector<16x128xf32>
    %cst_231 = arith.constant 5.000000e-01 : f32
    %397 = vector.broadcast %cst_231 : f32 to vector<16x128xf32>
    %398 = arith.addf %396, %397 : vector<16x128xf32>
    %399 = vector.extract_strided_slice %382 {offsets = [0, 256], sizes = [16, 128], strides = [1, 1]} : vector<16x512xf32> to vector<16x128xf32>
    %400 = math.tanh %399 : vector<16x128xf32>
    %401 = vector.extract_strided_slice %382 {offsets = [0, 384], sizes = [16, 128], strides = [1, 1]} : vector<16x512xf32> to vector<16x128xf32>
    %cst_232 = arith.constant 5.000000e-01 : f32
    %402 = vector.broadcast %cst_232 : f32 to vector<16x128xf32>
    %403 = arith.mulf %402, %401 : vector<16x128xf32>
    %404 = math.tanh %403 : vector<16x128xf32>
    %cst_233 = arith.constant 5.000000e-01 : f32
    %405 = vector.broadcast %cst_233 : f32 to vector<16x128xf32>
    %406 = arith.mulf %405, %404 : vector<16x128xf32>
    %cst_234 = arith.constant 5.000000e-01 : f32
    %407 = vector.broadcast %cst_234 : f32 to vector<16x128xf32>
    %408 = arith.addf %406, %407 : vector<16x128xf32>
    %409 = arith.mulf %398, %376 : vector<16x128xf32>
    %410 = arith.mulf %390, %400 : vector<16x128xf32>
    %411 = arith.addf %409, %410 : vector<16x128xf32>
    %412 = math.tanh %411 : vector<16x128xf32>
    %413 = arith.mulf %408, %412 : vector<16x128xf32>
    %414 = arith.truncf %413 : vector<16x128xf32> to vector<16x128xbf16>
    %c1_235 = arith.constant 1 : index
    %c0_236 = arith.constant 0 : index
    %c0_237 = arith.constant 0 : index
    %415 = vector.load %arg14[%c1_235, %c0_236, %c0_237] : memref<2x16x128xbf16, #tpu.memory_space<vmem>>, vector<1x16x128xbf16>
    %416 = vector.shape_cast %415 : vector<1x16x128xbf16> to vector<16x128xbf16>
    %417 = vector.shape_cast %414 : vector<16x128xbf16> to vector<1x16x128xbf16>
    tpu.vector_store %arg14[%c1_235, %c0_236, %c0_237], %417 {strides = array<i32>} : memref<2x16x128xbf16, #tpu.memory_space<vmem>>, vector<1x16x128xbf16>,
    %c1_238 = arith.constant 1 : index
    %c0_239 = arith.constant 0 : index
    %c0_240 = arith.constant 0 : index
    %418 = vector.load %arg15[%c1_238, %c0_239, %c0_240] : memref<2x16x128xf32, #tpu.memory_space<vmem>>, vector<1x16x128xf32>
    %419 = vector.shape_cast %418 : vector<1x16x128xf32> to vector<16x128xf32>
    %420 = vector.shape_cast %411 : vector<16x128xf32> to vector<1x16x128xf32>
    tpu.vector_store %arg15[%c1_238, %c0_239, %c0_240], %420 {strides = array<i32>} : memref<2x16x128xf32, #tpu.memory_space<vmem>>, vector<1x16x128xf32>,
    %c4_i32_241 = arith.constant 4 : i32
    %c1_i32_242 = arith.constant 1 : i32
    %421 = arith.cmpi eq, %arg1, %c1_i32_242 : i32
    %422 = arith.extui %421 : i1 to i32
    %c0_i32_243 = arith.constant 0 : i32
    %423 = arith.cmpi ne, %422, %c0_i32_243 : i32
    scf.if %423 {
      %c1_244 = arith.constant 1 : index
      %c0_245 = arith.constant 0 : index
      %c0_246 = arith.constant 0 : index
      %424 = vector.load %arg14[%c1_244, %c0_245, %c0_246] : memref<2x16x128xbf16, #tpu.memory_space<vmem>>, vector<1x16x128xbf16>
      %425 = vector.shape_cast %424 : vector<1x16x128xbf16> to vector<16x128xbf16>
      %c0_247 = arith.constant 0 : index
      %c0_248 = arith.constant 0 : index
      %426 = vector.load %arg9[%c0_247, %c0_248] : memref<128x4xbf16, #tpu.memory_space<vmem>>, vector<128x4xbf16>
      %cst_249 = arith.constant dense<0.000000e+00> : vector<16x4xf32>
      %427 = tpu.matmul %425, %426, %cst_249 {dimension_numbers = #tpu.dot_dimension_numbers<[1], [0], [0], [1], [0, 0, 1, 1], [], []>} : vector<16x128xbf16>, vector<128x4xbf16>, vector<16x4xf32> -> vector<16x4xf32>
      %c0_250 = arith.constant 0 : index
      %c0_251 = arith.constant 0 : index
      %428 = vector.load %arg10[%c0_250, %c0_251] : memref<1x4xf32, #tpu.memory_space<vmem>>, vector<1x4xf32>
      %429 = vector.broadcast %428 : vector<1x4xf32> to vector<16x4xf32>
      %430 = arith.addf %427, %429 : vector<16x4xf32>
      %c0_252 = arith.constant 0 : index
      %c0_253 = arith.constant 0 : index
      %431 = vector.load %arg11[%c0_252, %c0_253] : memref<16x4xf32, #tpu.memory_space<vmem>>, vector<16x4xf32>
      tpu.vector_store %arg11[%c0_252, %c0_253], %430 {strides = array<i32>} : memref<16x4xf32, #tpu.memory_space<vmem>>, vector<16x4xf32>,
    } else {
    }
    return
  }
  func.func @transform_0(%arg0: i32, %arg1: i32) -> (i32, i32, i32) {
    %c0_i32 = arith.constant 0 : i32
    %c0_i32_0 = arith.constant 0 : i32
    return %arg1, %arg0, %c0_i32 : i32, i32, i32
  }
  func.func @transform_1(%arg0: i32, %arg1: i32) -> (i32, i32) {
    %c0_i32 = arith.constant 0 : i32
    %c0_i32_0 = arith.constant 0 : i32
    %c0_i32_1 = arith.constant 0 : i32
    return %c0_i32, %c0_i32_0 : i32, i32
  }
  func.func @transform_2(%arg0: i32, %arg1: i32) -> (i32, i32) {
    %c0_i32 = arith.constant 0 : i32
    %c0_i32_0 = arith.constant 0 : i32
    %c0_i32_1 = arith.constant 0 : i32
    return %c0_i32, %c0_i32_0 : i32, i32
  }
  func.func @transform_3(%arg0: i32, %arg1: i32) -> (i32, i32) {
    %c0_i32 = arith.constant 0 : i32
    %c0_i32_0 = arith.constant 0 : i32
    %c0_i32_1 = arith.constant 0 : i32
    return %c0_i32, %c0_i32_0 : i32, i32
  }
  func.func @transform_4(%arg0: i32, %arg1: i32) -> (i32, i32) {
    %c0_i32 = arith.constant 0 : i32
    %c0_i32_0 = arith.constant 0 : i32
    %c0_i32_1 = arith.constant 0 : i32
    return %c0_i32, %c0_i32_0 : i32, i32
  }
  func.func @transform_5(%arg0: i32, %arg1: i32) -> (i32, i32) {
    %c0_i32 = arith.constant 0 : i32
    %c0_i32_0 = arith.constant 0 : i32
    %c0_i32_1 = arith.constant 0 : i32
    return %c0_i32, %c0_i32_0 : i32, i32
  }
  func.func @transform_6(%arg0: i32, %arg1: i32) -> (i32, i32) {
    %c0_i32 = arith.constant 0 : i32
    %c0_i32_0 = arith.constant 0 : i32
    %c0_i32_1 = arith.constant 0 : i32
    return %c0_i32, %c0_i32_0 : i32, i32
  }
  func.func @transform_7(%arg0: i32, %arg1: i32) -> (i32, i32) {
    %c0_i32 = arith.constant 0 : i32
    %c0_i32_0 = arith.constant 0 : i32
    %c0_i32_1 = arith.constant 0 : i32
    return %c0_i32, %c0_i32_0 : i32, i32
  }
  func.func @transform_8(%arg0: i32, %arg1: i32) -> (i32, i32) {
    %c0_i32 = arith.constant 0 : i32
    %c0_i32_0 = arith.constant 0 : i32
    %c0_i32_1 = arith.constant 0 : i32
    return %c0_i32, %c0_i32_0 : i32, i32
  }
  func.func @transform_9(%arg0: i32, %arg1: i32) -> (i32, i32) {
    %c0_i32 = arith.constant 0 : i32
    %c0_i32_0 = arith.constant 0 : i32
    return %arg0, %c0_i32 : i32, i32
  }
}

</mosaic_0001>

<bundles_post_ra>
// kernel: lstm_forward.1
= control target key start
LH: loop header
LB: loop body
LE: loop exit
PB: predicated region body
PF: predicated region fallthrough
CT: control target
= control target key end

     0   :  { %14 = vsyncpa [#allocation7], 0  ;;  %s5845_s0 = inlined_call_operand.vmem [shape: bf16[8,16,4], index: 0, kind: input, shape index: {}]   ;;  %s5846_s1 = inlined_call_operand.vmem [shape: bf16[4,512], index: 1, kind: input, shape index: {}]   ;;  %s5847_s2 = inlined_call_operand.hbm [shape: bf16[128,512], index: 2, kind: input, shape index: {}]   ;;  %s5848_s3 = inlined_call_operand.vmem [shape: f32[1,512], index: 3, kind: input, shape index: {}]   ;;  %s5849_s4 = inlined_call_operand.hbm [shape: bf16[128,512], index: 4, kind: input, shape index: {}]   ;;  %s5850_s5 = inlined_call_operand.hbm [shape: bf16[128,512], index: 5, kind: input, shape index: {}]   ;;  %s5851_s6 = inlined_call_operand.vmem [shape: f32[1,512], index: 6, kind: input, shape index: {}]   ;;  %s5852_s7 = inlined_call_operand.vmem [shape: bf16[128,4], index: 7, kind: input, shape index: {}]   ;;  %s5853_s8 = inlined_call_operand.vmem [shape: f32[1,4], index: 8, kind: input, shape index: {}]   ;;  %s5854_s9 = inlined_call_operand.vmem [shape: f32[16,4], index: 9, kind: output, shape index: {}]  }
   0x1   :  { %15 = vsyncpa [#allocation9], 0  ;;  %s5062_s30 = smov 0   ;;  %s5064_s10 = smov 0  }
   0x2   :  { %s5066_s11 = smov 0  }
   0x3 LB: > { %5859 = sst [smem:[#allocation13_spill]] %s4995_s10  ;;  %s4017_s12 = sadd.s32 4294967295, %s4999_s11   ;;  %s4999_s11 = sphi %s5066_s11, %s21_s11   ;;  %s4995_s10 = sphi %s5064_s10, %s5868_s10   ;;  %s4991_s30 = sphi %s5062_s30, %s5867_s30  }
   0x4   : > { %p4018_p0 = scmp.ge.s32.totalorder %s4999_s11, 1  ;;  %p260_p1 = scmp.lt.s32.totalorder %s4999_s11, 3 }
   0x5   : > { %p5080_p2 = scmp.eq.s32.totalorder %s4017_s12, 0  ;;  %s5001_s15 = smov [#allocation8]  }
   0x6   : > { %p5084_p3 = pnand %p4018_p0, %p260_p1  ;;  %s291_s16 = sshll.u32 %s5001_s15, 4  ;;  %s5088_s16 = int_to_ptr.vmem [resolvable:$true] %s291_s16 }
   0x7   : > { %s5860_s13 = scalar_select %p5080_p2, 1, 0 }
   0x8   : > { %s5861_s14 = scalar_select %p5084_p3, 1, 0 }
   0x9   : > { %p4517_p4 = pneg %p5084_p3  ;;  %s30_s18 = sadd.s32 1, %s4995_s10 }
   0xa   : > { %p5099_p6 = scmp.ge.s32.totalorder %s30_s18, 2  ;;  %s5002_s20 = smov [#allocation6]  }
   0xb   : > { %p5094_p5 = pnand %p5080_p2, %p4517_p4  ;;  %s275_s21 = sshll.u32 %s5002_s20, 4  ;;  %s276_s21 = int_to_ptr.vmem [resolvable:$true] %s275_s21 }
   0xc   : > { %s4885_s24 = scalar_lea.hbm %s5849_s4, 4096 }
   0xd   : > { %p4886_p7 = scmp.ne.s32.totalorder %s5849_s4, %s4885_s24  ;;  %p5111_p8 = pneg %p5094_p5 }
   0xe   : > { %p4892_p11 = scmp.lt.u32.totalorder %s4885_s24, %s5849_s4 }
   0xf   : > { %p4888_p9 = pnand %p5111_p8, %p4886_p7 }
  0x11   : > { %p4889_p10 = pneg %p4888_p9 }
  0x13   : > { %p4894_p12 = pnand %p4892_p11, %p4889_p10 }
  0x15   : > { %4897 = shalt.err (!%p4894_p12)
}
  0x16   : > { %s4898_s12 = scalar_lea.vmem %s5088_s16, 4096  ;;  %p4906_p4 = scmp.lt.s32.totalorder %s5088_s16, %s5088_s16 }
  0x17   : > { %p4899_p13 = scmp.ne.s32.totalorder %s5088_s16, %s4898_s12  ;;  %p4907_p2 = scmp.lt.s32.totalorder %s4898_s12, %s4898_s12 }
  0x19   : > { %p4901_p0 = pnand %p4899_p13, %p5111_p8  ;;  %p4908_p7 = por %p4907_p2, %p4906_p4 }
  0x1b   : > { %p4902_p1 = pneg %p4901_p0 }
  0x1d   : > { %p4909_p9 = pnand %p4908_p7, %p4902_p1 }
  0x1f   : > { %4912 = shalt.err (!%p4909_p9)
}
  0x20   : > { %s5003_s15 = smov 256   ;;  %s5004_s20 = smov 16  }
  0x21   : > { %4523 = dma.hbm_to_vmem [thread:$0]  (!%p5094_p5), %s5849_s4, 4096, %s5088_s16, [#allocation9], %s5003_s15, %s5003_s15, %s5004_s20  }
  0x22   : > { %s5870_s18 = smov (%p5099_p6, %s30_s18), 0  ;;  %s4913_s26 = scalar_lea.hbm %s5847_s2, 4096 }
  0x23   : > { %p4914_p2 = scmp.ne.s32.totalorder %s5847_s2, %s4913_s26  ;;  %p4920_p12 = scmp.lt.u32.totalorder %s4913_s26, %s5847_s2 }
  0x25   : > { %p4916_p10 = pnand %p4914_p2, %p5111_p8 }
  0x27   : > { %p4917_p11 = pneg %p4916_p10 }
  0x29   : > { %p4922_p13 = pnand %p4920_p12, %p4917_p11 }
  0x2b   : > { %4925 = shalt.err (!%p4922_p13)
}
  0x2c   : > { %s4926_s16 = scalar_lea.vmem %s276_s21, 4096  ;;  %p4934_p4 = scmp.lt.s32.totalorder %s276_s21, %s276_s21 }
  0x2d   : > { %p4927_p6 = scmp.ne.s32.totalorder %s276_s21, %s4926_s16  ;;  %p4935_p7 = scmp.lt.s32.totalorder %s4926_s16, %s4926_s16 }
  0x2f   : > { %p4929_p0 = pnand %p4927_p6, %p5111_p8  ;;  %p4936_p9 = por %p4935_p7, %p4934_p4 }
  0x31   : > { %p4930_p1 = pneg %p4929_p0 }
  0x33   : > { %p4937_p3 = pnand %p4936_p9, %p4930_p1 }
  0x35   : > { %4940 = shalt.err (!%p4937_p3)
}
  0x36   : > { %4520 = dma.hbm_to_vmem [thread:$0]  (!%p5094_p5), %s5847_s2, 4096, %s276_s21, [#allocation7], %s5003_s15, %s5003_s15, %s5004_s20  }
  0x37   : > { %s5005_s22 = smov [#allocation10]   ;;  %s4941_s26 = scalar_lea.hbm %s5850_s5, 4096 }
  0x38   : > { %s304_s23 = sshll.u32 %s5005_s22, 4  ;;  %p4942_p3 = scmp.ne.s32.totalorder %s5850_s5, %s4941_s26  ;;  %s305_s23 = int_to_ptr.vmem [resolvable:$true] %s304_s23 }
  0x39   : > { %p4948_p11 = scmp.lt.u32.totalorder %s4941_s26, %s5850_s5 }
  0x3a   : > { %p4944_p2 = pnand %p4942_p3, %p5111_p8 }
  0x3c   : > { %p4945_p10 = pneg %p4944_p2 }
  0x3e   : > { %p4950_p12 = pnand %p4948_p11, %p4945_p10 }
  0x40   : > { %4953 = shalt.err (!%p4950_p12)
}
  0x41   : > { %s4954_s21 = scalar_lea.vmem %s305_s23, 4096  ;;  %p4962_p1 = scmp.lt.s32.totalorder %s305_s23, %s305_s23 }
  0x42   : > { %p4955_p13 = scmp.ne.s32.totalorder %s305_s23, %s4954_s21  ;;  %p4963_p4 = scmp.lt.s32.totalorder %s4954_s21, %s4954_s21 }
  0x44   : > { %p4957_p6 = pnand %p4955_p13, %p5111_p8  ;;  %p4964_p7 = por %p4963_p4, %p4962_p1 }
  0x46   : > { %p4958_p0 = pneg %p4957_p6 }
  0x48   : > { %p4965_p9 = pnand %p4964_p7, %p4958_p0 }
  0x4a   : > { %4968 = shalt.err (!%p4965_p9)
}
  0x4b   : > { %4526 = dma.hbm_to_vmem [thread:$0]  (!%p5094_p5), %s5850_s5, 4096, %s305_s23, [#allocation9], %s5003_s15, %s5003_s15, %s5004_s20  }
  0x4c   : > { %p5865_p3 = scmp.ne.s32.totalorder %s5861_s14, 0 }
  0x4d   : > { %p5866_p8 = scmp.ne.s32.totalorder (!%p5865_p3), %s5860_s13, 0 }
  0x4e   : > { %344 = sbr.rel (%p5865_p3) target bundleno = 2414 (0x96e), region = 56 }
  0x55   : > { %4982 = dma.done.wait (%p5866_p8), [#allocation7], 4096  }
  0x56   : > { %4984 = vsyncadd (%p5866_p8), [#allocation7], 4294963200 }
  0x57   : > { %4986 = dma.done.wait (%p5866_p8), [#allocation9], 8192  }
  0x58   : > { %4988 = vsyncadd (%p5866_p8), [#allocation9], 4294959104  ;;  %s4027_s17 = sshll.u32 %s4991_s30, 2  ;;  %p4030_p5 = scmp.ne.s32.totalorder %s4991_s30, 0 }
  0x59   : > { %p395_p2 = scmp.lt.s32.totalorder %s4027_s17, 7  ;;  %v5006_v0 = vmov (!%p4030_p5), 0   ;;  %v5007_v1 = vmov (!%p4030_p5), 0.0  }
  0x5a   : > { %415 = sbr.rel (%p4030_p5) target bundleno = 97 (0x61), region = 72  ;;  %416 = vst [vmem:[#allocation4] sm:$0xff] (!%p4030_p5), %v5006_v0  ;;  %417 = vst [vmem:[#allocation4 + $0x8] sm:$0xff] (!%p4030_p5), %v5006_v0 }
  0x5b   : > { %s5872_s17 = smov (!%p395_p2, %s4027_s17), 7  ;;  %418 = vst [vmem:[#allocation5] sm:$0xff] (!%p4030_p5), %v5007_v1  ;;  %419 = vst [vmem:[#allocation5 + $0x8] sm:$0xff] (!%p4030_p5), %v5007_v1 }
  0x5c   : > { %s4347_s27 = sshll.u32 %s5872_s17, 3  ;;  %420 = vst [vmem:[#allocation5 + $0x10] sm:$0xff] (!%p4030_p5), %v5007_v1  ;;  %421 = vst [vmem:[#allocation5 + $0x18] sm:$0xff] (!%p4030_p5), %v5007_v1 }
  0x5d   : > { %s5195_s20 = scalar_lea.vmem %s5845_s0, %s4347_s27 }
  0x61 PF: > { %v430_v2 = vld [vmem:[%s5846_s1] sm:$0xff]  ;;  %v433_v3 = vlaneseq  ;;  %v5008_v4 = vmov 1983009808   ;;  %v5009_v6 = vmov 0   ;;  %vm504_vm0 = vcmask 1041408   ;;  %v4582_v28 = vld [vmem:[%s5195_s20 + $0x8] sm:$0xff]  }
  0x62   : > { %v476_v5 = vunpack.c.l.s4 %v5008_v4  ;;  %549 = vmatprep.mubr.bf16.mxu0 %v5009_v6  ;;  %622 = vmatprep.mubr.bf16.mxu1 %v5009_v6  ;;  %v474_v9 = vcombine.high %v430_v2, %v430_v2  ;;  %v5206_v13 = vld [vmem:[#allocation6 + $0x4] ss:$16 sps:$4 sm:$0xff]   ;;  %v5208_v18 = vld [vmem:[#allocation6 + $0xc] ss:$16 sps:$4 sm:$0xff]   ;;  %vm491_vm1 = vcmask 31744   ;;  %p4333_p10 = scmp.ne.s32.totalorder %s4991_s30, 1 }
  0x63   : > { %v5203_v7 = vshrl.u32 %v433_v3, 7  ;;  %v4569_v19 = vld [vmem:[%s5195_s20] sm:$0xff]   ;;  %v5213_v21 = vld [vmem:[#allocation6 + $0x8] ss:$16 sps:$4 sm:$0xff]   ;;  %v5219_v23 = vld [vmem:[#allocation6 + $0x2c] ss:$16 sps:$4 sm:$0xff]  }
  0x64   : > { %v477_v8 = vunpack.c.0.s8 %v476_v5  ;;  %v5211_v20 = vld [vmem:[#allocation6] ss:$16 sps:$4 sm:$0xff]   ;;  %v5217_v22 = vld [vmem:[#allocation6 + $0x24] ss:$16 sps:$4 sm:$0xff]   ;;  %v5227_v25 = vld [vmem:[#allocation6 + $0x28] ss:$16 sps:$4 sm:$0xff]  }
  0x65   : > { %v5223_v24 = vld [vmem:[#allocation6 + $0x20] ss:$16 sps:$4 sm:$0xff]   ;;  %v5231_v26 = vld [vmem:[#allocation6 + $0x44] ss:$16 sps:$4 sm:$0xff]   ;;  %v5233_v27 = vld [vmem:[#allocation6 + $0x4c] ss:$16 sps:$4 sm:$0xff]  }
  0x66   : > { %v480_v10 = vsub.s32 %v477_v8, %v5203_v7  ;;  %v5238_v29 = vld [vmem:[#allocation6 + $0x40] ss:$16 sps:$4 sm:$0xff]   ;;  %v5240_v30 = vld [vmem:[#allocation6 + $0x48] ss:$16 sps:$4 sm:$0xff]   ;;  %v5244_v31 = vld [vmem:[#allocation6 + $0x64] ss:$16 sps:$4 sm:$0xff]  }
  0x67   : > { %v5248_v32 = vld [vmem:[#allocation6 + $0x6c] ss:$16 sps:$4 sm:$0xff]   ;;  %v5252_v33 = vld [vmem:[#allocation6 + $0x60] ss:$16 sps:$4 sm:$0xff]   ;;  %v5254_v34 = vld [vmem:[#allocation6 + $0x68] ss:$16 sps:$4 sm:$0xff]  }
  0x68   : > { %v481_v11 = vrot.slane %v430_v2, %v480_v10  ;;  %v488_v12 = vrot.slane %v474_v9, %v480_v10  ;;  %v5258_v35 = vld [vmem:[#allocation6 + $0x84] ss:$16 sps:$4 sm:$0xff]   ;;  %v5262_v36 = vld [vmem:[#allocation6 + $0x8c] ss:$16 sps:$4 sm:$0xff]   ;;  %v5267_v38 = vld [vmem:[#allocation6 + $0x80] ss:$16 sps:$4 sm:$0xff]  }
  0x69   : > { %v4595_v37 = vld [vmem:[%s5195_s20 + $0x10] sm:$0xff]   ;;  %v5269_v39 = vld [vmem:[#allocation6 + $0x88] ss:$16 sps:$4 sm:$0xff]   ;;  %v5273_v41 = vld [vmem:[#allocation6 + $0xac] ss:$16 sps:$4 sm:$0xff]   ;;  %v435_v54 = vsub.s32 0, %v5203_v7 }
  0x6a   : > { %v489_v14 = vcombine.high %v481_v11, %v481_v11  ;;  %v490_v15 = vcombine.high %v488_v12, %v488_v12  ;;  %v506_v16 = vsel %vm504_vm0, %v481_v11, 0  ;;  %v512_v17 = vsel %vm504_vm0, %v488_v12, 0  ;;  %v5271_v40 = vld [vmem:[#allocation6 + $0xa4] ss:$16 sps:$4 sm:$0xff]   ;;  %v5279_v42 = vld [vmem:[#allocation6 + $0xa0] ss:$16 sps:$4 sm:$0xff]  }
  0x6b   : > { %v5281_v43 = vld [vmem:[#allocation6 + $0xa8] ss:$16 sps:$4 sm:$0xff]   ;;  %v5285_v44 = vld [vmem:[#allocation6 + $0xc4] ss:$16 sps:$4 sm:$0xff]   ;;  %v5287_v45 = vld [vmem:[#allocation6 + $0xcc] ss:$16 sps:$4 sm:$0xff]  }
  0x6c   : > { %4035 = vmatprep.subr.msk.bf16.mxu0 %vm504_vm0, %v489_v14  ;;  %4040 = vmatprep.subr.msk.bf16.mxu1 %vm504_vm0, %v490_v15  ;;  %v4608_v46 = vld [vmem:[%s5195_s20 + $0x18] sm:$0xff]   ;;  %v5296_v47 = vld [vmem:[#allocation6 + $0xc0] ss:$16 sps:$4 sm:$0xff]   ;;  %v5300_v49 = vld [vmem:[#allocation6 + $0xe4] ss:$16 sps:$4 sm:$0xff]   ;;  %v439_v55 = vsub.s32 1, %v5203_v7 }
  0x6d   : > { %518 = vmatpush1.bf16.msra.mxu0 %v506_v16  ;;  %591 = vmatpush1.bf16.msra.mxu1 %v512_v17  ;;  %v5298_v48 = vld [vmem:[#allocation6 + $0xc8] ss:$16 sps:$4 sm:$0xff]   ;;  %v5302_v50 = vld [vmem:[#allocation6 + $0xec] ss:$16 sps:$4 sm:$0xff]   ;;  %v5308_v51 = vld [vmem:[#allocation6 + $0xe0] ss:$16 sps:$4 sm:$0xff]  }
  0x6e   : > { %898 = vmatprep.subr.bf16.mxu0 %v5206_v13  ;;  %941 = vmatprep.subr.bf16.mxu1 %v5208_v18  ;;  %v5310_v52 = vld [vmem:[#allocation6 + $0xe8] ss:$16 sps:$4 sm:$0xff]   ;;  %v695_v53 = vld [vmem:[#allocation4] sm:$0xff]  ;;  %v443_v57 = vsub.s32 2, %v5203_v7  ;;  %v447_v11 = vsub.s32 3, %v5203_v7  ;;  %vm5011_vm2 = vmmov (!%p4333_p10), 0  }
  0x6f   : > { %v431_v56 = vld [vmem:[%s5848_s3] sm:$0xf] }
  0x70   : > { %4036 = vmatmul.mubr.msk.bf16.vlgmr.msra.gmra.mrb[0].mxu0 %vm491_vm1, %v4569_v19  ;;  %4041 = vmatmul.mubr.msk.bf16.vlgmr.msra.gmra.mrb[0].mxu1 %vm491_vm1, %v4569_v19  ;;  %v5366_v58 = vrot.slane %v431_v56, %v435_v54  ;;  %v5370_v59 = vrot.slane %v431_v56, %v439_v55  ;;  %v5375_v63 = vrot.slane %v431_v56, %v443_v57 }
  0x71   : > { %899 = vmatpush1.bf16.msra.mxu0 %v5211_v20  ;;  %942 = vmatpush1.bf16.msra.mxu1 %v5213_v21  ;;  %v5384_v19 = vrot.slane %v431_v56, %v447_v11  ;;  %v696_v56 = vld [vmem:[#allocation5] sm:$0xff] }
  0x72   : > { %900 = vmatprep.subr.bf16.mxu0 %v5217_v22  ;;  %943 = vmatprep.subr.bf16.mxu1 %v5219_v23 }
  0x73   : > { %559 = vmatprep.mubr.bf16.mxu0 %v5009_v6  ;;  %632 = vmatprep.mubr.bf16.mxu1 %v5009_v6 }
  0x75   : > { %901 = vmatpush1.bf16.msra.mxu0 %v5223_v24  ;;  %944 = vmatpush1.bf16.msra.mxu1 %v5227_v25 }
  0x76   : > { %902 = vmatprep.subr.bf16.mxu0 %v5231_v26  ;;  %945 = vmatprep.subr.bf16.mxu1 %v5233_v27 }
  0x78   : > { %4037 = vmatmul.mubr.msk.bf16.gmra.mrb[4].mxu0 %vm491_vm1, %v4582_v28  ;;  %4042 = vmatmul.mubr.msk.bf16.gmra.mrb[4].mxu1 %vm491_vm1, %v4582_v28 }
  0x79   : > { %903 = vmatpush1.bf16.msra.mxu0 %v5238_v29  ;;  %946 = vmatpush1.bf16.msra.mxu1 %v5240_v30 }
  0x7a   : > { %904 = vmatprep.subr.bf16.mxu0 %v5244_v31  ;;  %947 = vmatprep.subr.bf16.mxu1 %v5248_v32 }
  0x7b   : > { %569 = vmatprep.mubr.bf16.mxu0 %v5009_v6  ;;  %642 = vmatprep.mubr.bf16.mxu1 %v5009_v6 }
  0x7d   : > { %905 = vmatpush1.bf16.msra.mxu0 %v5252_v33  ;;  %948 = vmatpush1.bf16.msra.mxu1 %v5254_v34 }
  0x7e   : > { %906 = vmatprep.subr.bf16.mxu0 %v5258_v35  ;;  %949 = vmatprep.subr.bf16.mxu1 %v5262_v36 }
  0x80   : > { %4038 = vmatmul.mubr.msk.bf16.gmra.mrb[8].mxu0 %vm491_vm1, %v4595_v37  ;;  %4043 = vmatmul.mubr.msk.bf16.gmra.mrb[8].mxu1 %vm491_vm1, %v4595_v37 }
  0x81   : > { %907 = vmatpush1.bf16.msra.mxu0 %v5267_v38  ;;  %950 = vmatpush1.bf16.msra.mxu1 %v5269_v39 }
  0x82   : > { %908 = vmatprep.subr.bf16.mxu0 %v5271_v40  ;;  %951 = vmatprep.subr.bf16.mxu1 %v5273_v41 }
  0x83   : > { %579 = vmatprep.mubr.bf16.mxu0 %v5009_v6  ;;  %652 = vmatprep.mubr.bf16.mxu1 %v5009_v6 }
  0x85   : > { %909 = vmatpush1.bf16.msra.mxu0 %v5279_v42  ;;  %952 = vmatpush1.bf16.msra.mxu1 %v5281_v43 }
  0x86   : > { %910 = vmatprep.subr.bf16.mxu0 %v5285_v44  ;;  %953 = vmatprep.subr.bf16.mxu1 %v5287_v45 }
  0x88   : > { %4039 = vmatmul.mubr.msk.bf16.gmra.mrb[12].mxu0 %vm491_vm1, %v4608_v46  ;;  %4044 = vmatmul.mubr.msk.bf16.gmra.mrb[12].mxu1 %vm491_vm1, %v4608_v46 }
  0x89   : > { %911 = vmatpush1.bf16.msra.mxu0 %v5296_v47  ;;  %954 = vmatpush1.bf16.msra.mxu1 %v5298_v48 }
  0x8a   : > { %912 = vmatprep.subr.bf16.mxu0 %v5300_v49  ;;  %955 = vmatprep.subr.bf16.mxu1 %v5302_v50 }
  0x8b   : > { %930 = vmatprep.mubr.bf16.mxu0 %v5009_v6  ;;  %973 = vmatprep.mubr.bf16.mxu1 %v5009_v6 }
  0x8d   : > { %913 = vmatpush1.bf16.msra.mxu0 %v5308_v51  ;;  %956 = vmatpush1.bf16.msra.mxu1 %v5310_v52 }
  0x8e   : > { %1237 = vmatprep.subr.bf16.mxu0 %v5206_v13  ;;  %1280 = vmatprep.subr.bf16.mxu1 %v5208_v18 }
  0x90   : > { %931 = vmatmul.mubr.bf16.vlgmr.msra.gmra.mrb[0].mxu0 %v695_v53  ;;  %974 = vmatmul.mubr.bf16.vlgmr.msra.gmra.mrb[0].mxu1 %v695_v53 }
  0x91   : > { %1238 = vmatpush1.bf16.msra.mxu0 %v5211_v20  ;;  %1281 = vmatpush1.bf16.msra.mxu1 %v5213_v21 }
  0x92   : > { %1239 = vmatprep.subr.bf16.mxu0 %v5217_v22  ;;  %1282 = vmatprep.subr.bf16.mxu1 %v5219_v23 }
  0x93   : > { %1269 = vmatprep.mubr.bf16.mxu0 %v5009_v6  ;;  %1312 = vmatprep.mubr.bf16.mxu1 %v5009_v6 }
  0x95   : > { %1240 = vmatpush1.bf16.msra.mxu0 %v5223_v24  ;;  %1283 = vmatpush1.bf16.msra.mxu1 %v5227_v25 }
  0x96   : > { %1241 = vmatprep.subr.bf16.mxu0 %v5231_v26  ;;  %1284 = vmatprep.subr.bf16.mxu1 %v5233_v27 }
  0x99   : > { %1242 = vmatpush1.bf16.msra.mxu0 %v5238_v29  ;;  %1285 = vmatpush1.bf16.msra.mxu1 %v5240_v30 }
  0x9a   : > { %1243 = vmatprep.subr.bf16.mxu0 %v5244_v31  ;;  %1286 = vmatprep.subr.bf16.mxu1 %v5248_v32 }
  0x9d   : > { %1244 = vmatpush1.bf16.msra.mxu0 %v5252_v33  ;;  %1287 = vmatpush1.bf16.msra.mxu1 %v5254_v34 }
  0x9e   : > { %1245 = vmatprep.subr.bf16.mxu0 %v5258_v35  ;;  %1288 = vmatprep.subr.bf16.mxu1 %v5262_v36 }
  0xa1   : > { %1246 = vmatpush1.bf16.msra.mxu0 %v5267_v38  ;;  %1289 = vmatpush1.bf16.msra.mxu1 %v5269_v39 }
  0xa2   : > { %1247 = vmatprep.subr.bf16.mxu0 %v5271_v40  ;;  %1290 = vmatprep.subr.bf16.mxu1 %v5273_v41 }
  0xa5   : > { %1248 = vmatpush1.bf16.msra.mxu0 %v5279_v42  ;;  %1291 = vmatpush1.bf16.msra.mxu1 %v5281_v43 }
  0xa6   : > { %1249 = vmatprep.subr.bf16.mxu0 %v5285_v44  ;;  %1292 = vmatprep.subr.bf16.mxu1 %v5287_v45 }
  0xa9   : > { %1250 = vmatpush1.bf16.msra.mxu0 %v5296_v47  ;;  %1293 = vmatpush1.bf16.msra.mxu1 %v5298_v48 }
  0xaa   : > { %1251 = vmatprep.subr.bf16.mxu0 %v5300_v49  ;;  %1294 = vmatprep.subr.bf16.mxu1 %v5302_v50 }
  0xad   : > { %1252 = vmatpush1.bf16.msra.mxu0 %v5308_v51  ;;  %1295 = vmatpush1.bf16.msra.mxu1 %v5310_v52 }
  0xae   : > { %1577 = vmatprep.subr.bf16.mxu0 %v5206_v13  ;;  %1620 = vmatprep.subr.bf16.mxu1 %v5208_v18 }
 0x163   : > { %v932_v60 = vpop.f32.mrb[0].mxu0  ;;  %v975_v61 = vpop.f32.mrb[0].mxu1 }
 0x164   : > { %v4377_v62 = vadd.f32 %v932_v60, %v5366_v58  ;;  %v934_v0 = vpop.f32.mrb[1].mxu0  ;;  %v977_v1 = vpop.f32.mrb[1].mxu1  ;;  %v4393_v15 = vadd.f32 %v975_v61, %v5375_v63 }
 0x165   : > { %v4378_v2 = vadd.f32 %v934_v0, %v5370_v59  ;;  %v936_v3 = vpop.f32.mrb[2].mxu0  ;;  %v979_v4 = vpop.f32.mrb[2].mxu1  ;;  %v4394_v37 = vadd.f32 %v977_v1, %v5384_v19 }
 0x166   : > { %v992_v5 = vmul.f32 0.5, %v4377_v62  ;;  %v4379_v8 = vadd.f32 %v936_v3, %v5366_v58  ;;  %v938_v9 = vpop.f32.mrb[3].mxu0  ;;  %v981_v10 = vpop.f32.mrb[3].mxu1  ;;  %v4395_v28 = vadd.f32 %v979_v4, %v5375_v63 }
 0x167   : > { %v1000_v12 = vmul.f32 0.5, %v4378_v2  ;;  %v4380_v14 = vadd.f32 %v938_v9, %v5370_v59  ;;  %v4396_v46 = vadd.f32 %v981_v10, %v5384_v19  ;;  %v1010_v62 = vmul.f32 0.5, %v4394_v37 }
 0x168   : > { %4717 = vtanh.f32 %v992_v5  ;;  %v993_v16 = vmul.f32 0.5, %v4379_v8 }
 0x169   : > { %4719 = vtanh.f32 %v1000_v12  ;;  %v1001_v17 = vmul.f32 0.5, %v4380_v14  ;;  %v1011_v2 = vmul.f32 0.5, %v4396_v46 }
 0x16a   : > { %4721 = vtanh.f32 %v993_v16 }
 0x16b   : > { %4723 = vtanh.f32 %v4393_v15 }
 0x16c   : > { %4725 = vtanh.f32 %v1001_v17  ;;  %v697_v17 = vld [vmem:[#allocation5 + $0x8] sm:$0xff] }
 0x16d   : > { %4727 = vtanh.f32 %v4395_v28 }
 0x16e   : > { %4729 = vtanh.f32 %v1010_v62 }
 0x16f   : > { %4731 = vtanh.f32 %v1011_v2 }
 0x172   : > { %v4718_v53 = vpop.eup %4717 }
 0x173   : > { %v4720_v60 = vpop.eup %4719  ;;  %v996_v61 = vmul.f32 0.5, %v4718_v53 }
 0x174   : > { %v1004_v0 = vmul.f32 0.5, %v4720_v60  ;;  %v4722_v3 = vpop.eup %4721 }
 0x175   : > { %v998_v5 = vadd.f32 0.5, %v996_v61  ;;  %v4724_v8 = vpop.eup %4723  ;;  %v997_v12 = vmul.f32 0.5, %v4722_v3 }
 0x176   : > { %v1006_v9 = vadd.f32 0.5, %v1004_v0  ;;  %v4726_v4 = vpop.eup %4725 }
 0x177   : > { %v1020_v14 = vmul.f32 %v4724_v8, %v998_v5  ;;  %v999_v1 = vadd.f32 0.5, %v997_v12  ;;  %v1005_v16 = vmul.f32 0.5, %v4726_v4  ;;  %v4728_v10 = vpop.eup %4727 }
 0x178   : > { %v1018_v15 = vmul.f32 %v1006_v9, %v696_v56  ;;  %v4730_v61 = vpop.eup %4729 }
 0x179   : > { %v1007_v37 = vadd.f32 0.5, %v1005_v16  ;;  %v1021_v53 = vmul.f32 %v4728_v10, %v999_v1  ;;  %v4732_v0 = vpop.eup %4731  ;;  %v1014_v62 = vmul.f32 0.5, %v4730_v61 }
 0x17a   : > { %v5389_v28 = vadd.f32 %v1020_v14, %v1018_v15  ;;  %v1015_v3 = vmul.f32 0.5, %v4732_v0 }
 0x17b   : > { %v1019_v46 = vmul.f32 %v1007_v37, %v697_v17  ;;  %v1016_v56 = vadd.f32 0.5, %v1014_v62 }
 0x17c   : > { %4733 = vtanh.f32 %v5389_v28  ;;  %v1017_v2 = vadd.f32 0.5, %v1015_v3 }
 0x17d   : > { %v5392_v60 = vadd.f32 %v1021_v53, %v1019_v46 }
 0x17f   : > { %4735 = vtanh.f32 %v5392_v60 }
 0x186   : > { %v4734_v5 = vpop.eup %4733 }
 0x187   : > { %v1026_v9 = vmul.f32 %v4734_v5, %v1016_v56 }
 0x189   : > { %v4736_v8 = vpop.eup %4735 }
 0x18a   : > { %v1027_v12 = vmul.f32 %v4736_v8, %v1017_v2 }
 0x18c   : > { %v5395_v4 = vpack.c.bf16 %v1027_v12, %v1026_v9 }
 0x18e   : > { %1270 = vmatmul.mubr.bf16.vlgmr.msra.gmra.mrb[4].mxu0 %v5395_v4  ;;  %1313 = vmatmul.mubr.bf16.vlgmr.msra.gmra.mrb[4].mxu1 %v5395_v4 }
 0x18f   : > { %1578 = vmatpush1.bf16.msra.mxu0 %v5211_v20  ;;  %1621 = vmatpush1.bf16.msra.mxu1 %v5213_v21 }
 0x190   : > { %1579 = vmatprep.subr.bf16.mxu0 %v5217_v22  ;;  %1622 = vmatprep.subr.bf16.mxu1 %v5219_v23 }
 0x191   : > { %1609 = vmatprep.mubr.bf16.mxu0 %v5009_v6  ;;  %1652 = vmatprep.mubr.bf16.mxu1 %v5009_v6 }
 0x193   : > { %1580 = vmatpush1.bf16.msra.mxu0 %v5223_v24  ;;  %1623 = vmatpush1.bf16.msra.mxu1 %v5227_v25 }
 0x194   : > { %1581 = vmatprep.subr.bf16.mxu0 %v5231_v26  ;;  %1624 = vmatprep.subr.bf16.mxu1 %v5233_v27 }
 0x197   : > { %1582 = vmatpush1.bf16.msra.mxu0 %v5238_v29  ;;  %1625 = vmatpush1.bf16.msra.mxu1 %v5240_v30 }
 0x198   : > { %1583 = vmatprep.subr.bf16.mxu0 %v5244_v31  ;;  %1626 = vmatprep.subr.bf16.mxu1 %v5248_v32 }
 0x19b   : > { %1584 = vmatpush1.bf16.msra.mxu0 %v5252_v33  ;;  %1627 = vmatpush1.bf16.msra.mxu1 %v5254_v34 }
 0x19c   : > { %1585 = vmatprep.subr.bf16.mxu0 %v5258_v35  ;;  %1628 = vmatprep.subr.bf16.mxu1 %v5262_v36 }
 0x19f   : > { %1586 = vmatpush1.bf16.msra.mxu0 %v5267_v38  ;;  %1629 = vmatpush1.bf16.msra.mxu1 %v5269_v39 }
 0x1a0   : > { %1587 = vmatprep.subr.bf16.mxu0 %v5271_v40  ;;  %1630 = vmatprep.subr.bf16.mxu1 %v5273_v41 }
 0x1a3   : > { %1588 = vmatpush1.bf16.msra.mxu0 %v5279_v42  ;;  %1631 = vmatpush1.bf16.msra.mxu1 %v5281_v43 }
 0x1a4   : > { %1589 = vmatprep.subr.bf16.mxu0 %v5285_v44  ;;  %1632 = vmatprep.subr.bf16.mxu1 %v5287_v45 }
 0x1a7   : > { %1590 = vmatpush1.bf16.msra.mxu0 %v5296_v47  ;;  %1633 = vmatpush1.bf16.msra.mxu1 %v5298_v48 }
 0x1a8   : > { %1591 = vmatprep.subr.bf16.mxu0 %v5300_v49  ;;  %1634 = vmatprep.subr.bf16.mxu1 %v5302_v50 }
 0x1ab   : > { %1592 = vmatpush1.bf16.msra.mxu0 %v5308_v51  ;;  %1635 = vmatpush1.bf16.msra.mxu1 %v5310_v52 }
 0x1ac   : > { %1917 = vmatprep.subr.bf16.mxu0 %v5206_v13  ;;  %1960 = vmatprep.subr.bf16.mxu1 %v5208_v18 }
 0x261   : > { %v1271_v14 = vpop.f32.mrb[4].mxu0  ;;  %v1314_v15 = vpop.f32.mrb[4].mxu1 }
 0x262   : > { %v4381_v1 = vadd.f32 %v1271_v14, %v5366_v58  ;;  %v1273_v16 = vpop.f32.mrb[5].mxu0  ;;  %v1316_v10 = vpop.f32.mrb[5].mxu1  ;;  %v4397_v18 = vadd.f32 %v1314_v15, %v5375_v63 }
 0x263   : > { %v4382_v17 = vadd.f32 %v1273_v16, %v5370_v59  ;;  %v1275_v37 = vpop.f32.mrb[6].mxu0  ;;  %v1318_v53 = vpop.f32.mrb[6].mxu1  ;;  %v4398_v8 = vadd.f32 %v1316_v10, %v5384_v19 }
 0x264   : > { %v1331_v46 = vmul.f32 0.5, %v4381_v1  ;;  %v4383_v61 = vadd.f32 %v1275_v37, %v5366_v58  ;;  %v1277_v0 = vpop.f32.mrb[7].mxu0  ;;  %v1320_v62 = vpop.f32.mrb[7].mxu1  ;;  %v4399_v2 = vadd.f32 %v1318_v53, %v5375_v63 }
 0x265   : > { %v1339_v3 = vmul.f32 0.5, %v4382_v17  ;;  %v4384_v13 = vadd.f32 %v1277_v0, %v5370_v59  ;;  %v4400_v9 = vadd.f32 %v1320_v62, %v5384_v19  ;;  %v1349_v16 = vmul.f32 0.5, %v4398_v8 }
 0x266   : > { %4737 = vtanh.f32 %v1331_v46  ;;  %v1332_v5 = vmul.f32 0.5, %v4383_v61 }
 0x267   : > { %4739 = vtanh.f32 %v1339_v3  ;;  %v1340_v56 = vmul.f32 0.5, %v4384_v13  ;;  %v1350_v37 = vmul.f32 0.5, %v4400_v9 }
 0x268   : > { %4741 = vtanh.f32 %v1332_v5 }
 0x269   : > { %4743 = vtanh.f32 %v4397_v18 }
 0x26a   : > { %4745 = vtanh.f32 %v1340_v56 }
 0x26b   : > { %4747 = vtanh.f32 %v4399_v2 }
 0x26c   : > { %4749 = vtanh.f32 %v1349_v16 }
 0x26d   : > { %4751 = vtanh.f32 %v1350_v37 }
 0x270   : > { %v4738_v12 = vpop.eup %4737 }
 0x271   : > { %v4740_v14 = vpop.eup %4739  ;;  %v1335_v1 = vmul.f32 0.5, %v4738_v12 }
 0x272   : > { %v1343_v17 = vmul.f32 0.5, %v4740_v14  ;;  %v4742_v15 = vpop.eup %4741 }
 0x273   : > { %v1337_v46 = vadd.f32 0.5, %v1335_v1  ;;  %v4744_v61 = vpop.eup %4743  ;;  %v1336_v3 = vmul.f32 0.5, %v4742_v15 }
 0x274   : > { %v1345_v0 = vadd.f32 0.5, %v1343_v17  ;;  %v4746_v13 = vpop.eup %4745 }
 0x275   : > { %v1359_v53 = vmul.f32 %v4744_v61, %v1337_v46  ;;  %v1338_v10 = vadd.f32 0.5, %v1336_v3  ;;  %v1344_v5 = vmul.f32 0.5, %v4746_v13  ;;  %v4748_v62 = vpop.eup %4747 }
 0x276   : > { %v1357_v18 = vmul.f32 %v1345_v0, %v5389_v28  ;;  %v4750_v14 = vpop.eup %4749 }
 0x277   : > { %v1346_v2 = vadd.f32 0.5, %v1344_v5  ;;  %v1360_v8 = vmul.f32 %v4748_v62, %v1338_v10  ;;  %v4752_v1 = vpop.eup %4751  ;;  %v1353_v16 = vmul.f32 0.5, %v4750_v14 }
 0x278   : > { %v5442_v56 = vadd.f32 %v1359_v53, %v1357_v18  ;;  %v1354_v28 = vmul.f32 0.5, %v4752_v1 }
 0x279   : > { %v1358_v9 = vmul.f32 %v1346_v2, %v5392_v60  ;;  %v1355_v15 = vadd.f32 0.5, %v1353_v16 }
 0x27a   : > { %4753 = vtanh.f32 %v5442_v56  ;;  %v1356_v37 = vadd.f32 0.5, %v1354_v28 }
 0x27b   : > { %v5446_v12 = vadd.f32 %v1360_v8, %v1358_v9 }
 0x27d   : > { %4755 = vtanh.f32 %v5446_v12 }
 0x284   : > { %v4754_v17 = vpop.eup %4753 }
 0x285   : > { %v1365_v61 = vmul.f32 %v4754_v17, %v1355_v15 }
 0x287   : > { %v4756_v46 = vpop.eup %4755 }
 0x288   : > { %v1366_v0 = vmul.f32 %v4756_v46, %v1356_v37 }
 0x28a   : > { %v5449_v3 = vpack.c.bf16 %v1366_v0, %v1365_v61 }
 0x28c   : > { %1610 = vmatmul.mubr.bf16.vlgmr.msra.gmra.mrb[8].mxu0 %v5449_v3  ;;  %1653 = vmatmul.mubr.bf16.vlgmr.msra.gmra.mrb[8].mxu1 %v5449_v3 }
 0x28d   : > { %1918 = vmatpush1.bf16.msra.mxu0 %v5211_v20  ;;  %1961 = vmatpush1.bf16.msra.mxu1 %v5213_v21  ;;  %v4623_v20 = vld [vmem:[#allocation8 + $0x4] ss:$16 sps:$4 sm:$0xff]   ;;  %v4626_v21 = vld [vmem:[#allocation8 + $0xc] ss:$16 sps:$4 sm:$0xff]  }
 0x28e   : > { %1919 = vmatprep.subr.bf16.mxu0 %v5217_v22  ;;  %1962 = vmatprep.subr.bf16.mxu1 %v5219_v23 }
 0x28f   : > { %1949 = vmatprep.mubr.bf16.mxu0 %v5009_v6  ;;  %1992 = vmatprep.mubr.bf16.mxu1 %v5009_v6 }
 0x291   : > { %1920 = vmatpush1.bf16.msra.mxu0 %v5223_v24  ;;  %1963 = vmatpush1.bf16.msra.mxu1 %v5227_v25 }
 0x292   : > { %1921 = vmatprep.subr.bf16.mxu0 %v5231_v26  ;;  %1964 = vmatprep.subr.bf16.mxu1 %v5233_v27 }
 0x295   : > { %1922 = vmatpush1.bf16.msra.mxu0 %v5238_v29  ;;  %1965 = vmatpush1.bf16.msra.mxu1 %v5240_v30 }
 0x296   : > { %1923 = vmatprep.subr.bf16.mxu0 %v5244_v31  ;;  %1966 = vmatprep.subr.bf16.mxu1 %v5248_v32 }
 0x299   : > { %1924 = vmatpush1.bf16.msra.mxu0 %v5252_v33  ;;  %1967 = vmatpush1.bf16.msra.mxu1 %v5254_v34 }
 0x29a   : > { %1925 = vmatprep.subr.bf16.mxu0 %v5258_v35  ;;  %1968 = vmatprep.subr.bf16.mxu1 %v5262_v36 }
 0x29d   : > { %1926 = vmatpush1.bf16.msra.mxu0 %v5267_v38  ;;  %1969 = vmatpush1.bf16.msra.mxu1 %v5269_v39 }
 0x29e   : > { %1927 = vmatprep.subr.bf16.mxu0 %v5271_v40  ;;  %1970 = vmatprep.subr.bf16.mxu1 %v5273_v41 }
 0x2a1   : > { %1928 = vmatpush1.bf16.msra.mxu0 %v5279_v42  ;;  %1971 = vmatpush1.bf16.msra.mxu1 %v5281_v43 }
 0x2a2   : > { %1929 = vmatprep.subr.bf16.mxu0 %v5285_v44  ;;  %1972 = vmatprep.subr.bf16.mxu1 %v5287_v45 }
 0x2a5   : > { %1930 = vmatpush1.bf16.msra.mxu0 %v5296_v47  ;;  %1973 = vmatpush1.bf16.msra.mxu1 %v5298_v48 }
 0x2a6   : > { %1931 = vmatprep.subr.bf16.mxu0 %v5300_v49  ;;  %1974 = vmatprep.subr.bf16.mxu1 %v5302_v50 }
 0x2a9   : > { %1932 = vmatpush1.bf16.msra.mxu0 %v5308_v51  ;;  %1975 = vmatpush1.bf16.msra.mxu1 %v5310_v52 }
 0x2aa   : > { %2271 = vmatprep.subr.bf16.mxu0 %v4623_v20  ;;  %2344 = vmatprep.subr.bf16.mxu1 %v4626_v21 }
 0x35f   : > { %v1611_v22 = vpop.f32.mrb[8].mxu0  ;;  %v1654_v23 = vpop.f32.mrb[8].mxu1 }
 0x360   : > { %v4385_v24 = vadd.f32 %v1611_v22, %v5366_v58  ;;  %v1613_v25 = vpop.f32.mrb[9].mxu0  ;;  %v1656_v26 = vpop.f32.mrb[9].mxu1  ;;  %v4401_v38 = vadd.f32 %v1654_v23, %v5375_v63  ;;  %v4621_v23 = vld [vmem:[#allocation8] ss:$16 sps:$4 sm:$0xff]  }
 0x361   : > { %v4386_v27 = vadd.f32 %v1613_v25, %v5370_v59  ;;  %v1615_v29 = vpop.f32.mrb[10].mxu0  ;;  %v1658_v30 = vpop.f32.mrb[10].mxu1  ;;  %v4402_v42 = vadd.f32 %v1656_v26, %v5384_v19  ;;  %v4632_v26 = vld [vmem:[#allocation8 + $0x2c] ss:$16 sps:$4 sm:$0xff]  }
 0x362   : > { %v1671_v31 = vmul.f32 0.5, %v4385_v24  ;;  %v4387_v32 = vadd.f32 %v1615_v29, %v5366_v58  ;;  %v1617_v33 = vpop.f32.mrb[11].mxu0  ;;  %v1660_v34 = vpop.f32.mrb[11].mxu1  ;;  %v4403_v41 = vadd.f32 %v1658_v30, %v5375_v63  ;;  %v4624_v24 = vld [vmem:[#allocation8 + $0x8] ss:$16 sps:$4 sm:$0xff]  }
 0x363   : > { %v1679_v35 = vmul.f32 0.5, %v4386_v27  ;;  %v4388_v36 = vadd.f32 %v1617_v33, %v5370_v59  ;;  %v4404_v43 = vadd.f32 %v1660_v34, %v5384_v19  ;;  %v1689_v48 = vmul.f32 0.5, %v4402_v42  ;;  %v4627_v27 = vld [vmem:[#allocation8 + $0x20] ss:$16 sps:$4 sm:$0xff]   ;;  %v4630_v29 = vld [vmem:[#allocation8 + $0x28] ss:$16 sps:$4 sm:$0xff]  }
 0x364   : > { %4757 = vtanh.f32 %v1671_v31  ;;  %v1672_v39 = vmul.f32 0.5, %v4387_v32  ;;  %v4635_v30 = vld [vmem:[#allocation8 + $0x44] ss:$16 sps:$4 sm:$0xff]   ;;  %v4638_v31 = vld [vmem:[#allocation8 + $0x4c] ss:$16 sps:$4 sm:$0xff]  }
 0x365   : > { %4759 = vtanh.f32 %v1679_v35  ;;  %v1680_v40 = vmul.f32 0.5, %v4388_v36  ;;  %v1690_v50 = vmul.f32 0.5, %v4404_v43  ;;  %v4633_v32 = vld [vmem:[#allocation8 + $0x40] ss:$16 sps:$4 sm:$0xff]   ;;  %v4636_v33 = vld [vmem:[#allocation8 + $0x48] ss:$16 sps:$4 sm:$0xff]  }
 0x366   : > { %4761 = vtanh.f32 %v1672_v39  ;;  %v4641_v34 = vld [vmem:[#allocation8 + $0x64] ss:$16 sps:$4 sm:$0xff]   ;;  %v4644_v35 = vld [vmem:[#allocation8 + $0x6c] ss:$16 sps:$4 sm:$0xff]   ;;  %v4639_v36 = vld [vmem:[#allocation8 + $0x60] ss:$16 sps:$4 sm:$0xff]  }
 0x367   : > { %4763 = vtanh.f32 %v4401_v38  ;;  %v4642_v38 = vld [vmem:[#allocation8 + $0x68] ss:$16 sps:$4 sm:$0xff]   ;;  %v4647_v39 = vld [vmem:[#allocation8 + $0x84] ss:$16 sps:$4 sm:$0xff]  }
 0x368   : > { %4765 = vtanh.f32 %v1680_v40  ;;  %v4650_v40 = vld [vmem:[#allocation8 + $0x8c] ss:$16 sps:$4 sm:$0xff]   ;;  %v4648_v42 = vld [vmem:[#allocation8 + $0x88] ss:$16 sps:$4 sm:$0xff]   ;;  %v4653_v43 = vld [vmem:[#allocation8 + $0xa4] ss:$16 sps:$4 sm:$0xff]  }
 0x369   : > { %4767 = vtanh.f32 %v4403_v41  ;;  %v4645_v41 = vld [vmem:[#allocation8 + $0x80] ss:$16 sps:$4 sm:$0xff]  }
 0x36a   : > { %4769 = vtanh.f32 %v1689_v48  ;;  %v4659_v48 = vld [vmem:[#allocation8 + $0xc4] ss:$16 sps:$4 sm:$0xff]  }
 0x36b   : > { %4771 = vtanh.f32 %v1690_v50  ;;  %v4657_v50 = vld [vmem:[#allocation8 + $0xc0] ss:$16 sps:$4 sm:$0xff]  }
 0x36e   : > { %v4758_v44 = vpop.eup %4757 }
 0x36f   : > { %v4760_v45 = vpop.eup %4759  ;;  %v1675_v47 = vmul.f32 0.5, %v4758_v44  ;;  %v4656_v44 = vld [vmem:[#allocation8 + $0xac] ss:$16 sps:$4 sm:$0xff]  }
 0x370   : > { %v1683_v49 = vmul.f32 0.5, %v4760_v45  ;;  %v4762_v51 = vpop.eup %4761  ;;  %v4651_v45 = vld [vmem:[#allocation8 + $0xa0] ss:$16 sps:$4 sm:$0xff]  }
 0x371   : > { %v1677_v52 = vadd.f32 0.5, %v1675_v47  ;;  %v4764_v60 = vpop.eup %4763  ;;  %v1676_v53 = vmul.f32 0.5, %v4762_v51  ;;  %v4654_v47 = vld [vmem:[#allocation8 + $0xa8] ss:$16 sps:$4 sm:$0xff]  }
 0x372   : > { %v1685_v13 = vadd.f32 0.5, %v1683_v49  ;;  %v4766_v18 = vpop.eup %4765  ;;  %v4662_v49 = vld [vmem:[#allocation8 + $0xcc] ss:$16 sps:$4 sm:$0xff]   ;;  %v4660_v51 = vld [vmem:[#allocation8 + $0xc8] ss:$16 sps:$4 sm:$0xff]  }
 0x373   : > { %v1699_v10 = vmul.f32 %v4764_v60, %v1677_v52  ;;  %v1678_v62 = vadd.f32 0.5, %v1676_v53  ;;  %v1684_v2 = vmul.f32 0.5, %v4766_v18  ;;  %v4768_v8 = vpop.eup %4767  ;;  %v4665_v52 = vld [vmem:[#allocation8 + $0xe4] ss:$16 sps:$4 sm:$0xff]   ;;  %v4668_v60 = vld [vmem:[#allocation8 + $0xec] ss:$16 sps:$4 sm:$0xff]  }
 0x374   : > { %v1697_v5 = vmul.f32 %v1685_v13, %v5442_v56  ;;  %v4770_v17 = vpop.eup %4769  ;;  %v4663_v13 = vld [vmem:[#allocation8 + $0xe0] ss:$16 sps:$4 sm:$0xff]   ;;  %v4666_v53 = vld [vmem:[#allocation8 + $0xe8] ss:$16 sps:$4 sm:$0xff]   ;;  %v5521_v18 = vld [vmem:[#allocation10 + $0xc] ss:$16 sps:$4 sm:$0xff]  }
 0x375   : > { %v1686_v14 = vadd.f32 0.5, %v1684_v2  ;;  %v1700_v1 = vmul.f32 %v4768_v8, %v1678_v62  ;;  %v4772_v15 = vpop.eup %4771  ;;  %v1693_v37 = vmul.f32 0.5, %v4770_v17  ;;  %v5533_v62 = vld [vmem:[#allocation10 + $0x2c] ss:$16 sps:$4 sm:$0xff]   ;;  %v5535_v2 = vld [vmem:[#allocation10 + $0x20] ss:$16 sps:$4 sm:$0xff]  }
 0x376   : > { %v5494_v9 = vadd.f32 %v1699_v10, %v1697_v5  ;;  %v1694_v56 = vmul.f32 0.5, %v4772_v15  ;;  %v5523_v10 = vld [vmem:[#allocation10] ss:$16 sps:$4 sm:$0xff]   ;;  %v5525_v5 = vld [vmem:[#allocation10 + $0x8] ss:$16 sps:$4 sm:$0xff]  }
 0x377   : > { %v1698_v16 = vmul.f32 %v1686_v14, %v5446_v12  ;;  %v1695_v61 = vadd.f32 0.5, %v1693_v37  ;;  %v4629_v12 = vld [vmem:[#allocation8 + $0x24] ss:$16 sps:$4 sm:$0xff]   ;;  %v5537_v8 = vld [vmem:[#allocation10 + $0x28] ss:$16 sps:$4 sm:$0xff]  }
 0x378   : > { %4773 = vtanh.f32 %v5494_v9  ;;  %v1696_v0 = vadd.f32 0.5, %v1694_v56  ;;  %v5543_v14 = vld [vmem:[#allocation10 + $0x44] ss:$16 sps:$4 sm:$0xff]   ;;  %v5549_v17 = vld [vmem:[#allocation10 + $0x48] ss:$16 sps:$4 sm:$0xff]  }
 0x379   : > { %v5498_v28 = vadd.f32 %v1700_v1, %v1698_v16  ;;  %v5545_v1 = vld [vmem:[#allocation10 + $0x4c] ss:$16 sps:$4 sm:$0xff]   ;;  %v5547_v16 = vld [vmem:[#allocation10 + $0x40] ss:$16 sps:$4 sm:$0xff]   ;;  %v5553_v15 = vld [vmem:[#allocation10 + $0x64] ss:$16 sps:$4 sm:$0xff]  }
 0x37a   : > { %v5555_v37 = vld [vmem:[#allocation10 + $0x6c] ss:$16 sps:$4 sm:$0xff]   ;;  %v5559_v56 = vld [vmem:[#allocation10 + $0x60] ss:$16 sps:$4 sm:$0xff]  }
 0x37b   : > { %4775 = vtanh.f32 %v5498_v28 }
 0x382   : > { %v4774_v46 = vpop.eup %4773 }
 0x383   : > { %v1705_v21 = vmul.f32 %v4774_v46, %v1695_v61  ;;  %v5561_v46 = vld [vmem:[#allocation10 + $0x68] ss:$16 sps:$4 sm:$0xff]   ;;  %v5565_v61 = vld [vmem:[#allocation10 + $0x84] ss:$16 sps:$4 sm:$0xff]  }
 0x385   : > { %v4776_v20 = vpop.eup %4775 }
 0x386   : > { %v1706_v22 = vmul.f32 %v4776_v20, %v1696_v0  ;;  %v5567_v0 = vld [vmem:[#allocation10 + $0x8c] ss:$16 sps:$4 sm:$0xff]   ;;  %v5571_v20 = vld [vmem:[#allocation10 + $0x80] ss:$16 sps:$4 sm:$0xff]  }
 0x388   : > { %v5501_v25 = vpack.c.bf16 %v1706_v22, %v1705_v21  ;;  %v5573_v21 = vld [vmem:[#allocation10 + $0x88] ss:$16 sps:$4 sm:$0xff]   ;;  %v5577_v22 = vld [vmem:[#allocation10 + $0xa4] ss:$16 sps:$4 sm:$0xff]  }
 0x38a   : > { %1950 = vmatmul.mubr.bf16.vlgmr.msra.gmra.mrb[12].mxu0 %v5501_v25  ;;  %1993 = vmatmul.mubr.bf16.vlgmr.msra.gmra.mrb[12].mxu1 %v5501_v25 }
 0x38b   : > { %2272 = vmatpush1.bf16.msra.mxu0 %v4621_v23  ;;  %2345 = vmatpush1.bf16.msra.mxu1 %v4624_v24  ;;  %v5579_v23 = vld [vmem:[#allocation10 + $0xac] ss:$16 sps:$4 sm:$0xff]   ;;  %v5583_v24 = vld [vmem:[#allocation10 + $0xa0] ss:$16 sps:$4 sm:$0xff]  }
 0x38c   : > { %2273 = vmatprep.subr.bf16.mxu0 %v4629_v12  ;;  %2346 = vmatprep.subr.bf16.mxu1 %v4632_v26  ;;  %v5591_v12 = vld [vmem:[#allocation10 + $0xc0] ss:$16 sps:$4 sm:$0xff]   ;;  %v5593_v26 = vld [vmem:[#allocation10 + $0xc4] ss:$16 sps:$4 sm:$0xff]  }
 0x38d   : > { %2303 = vmatprep.mubr.bf16.mxu0 %v5009_v6  ;;  %2376 = vmatprep.mubr.bf16.mxu1 %v5009_v6 }
 0x38f   : > { %2274 = vmatpush1.bf16.msra.mxu0 %v4627_v27  ;;  %2347 = vmatpush1.bf16.msra.mxu1 %v4630_v29  ;;  %v5595_v27 = vld [vmem:[#allocation10 + $0xc8] ss:$16 sps:$4 sm:$0xff]   ;;  %v5597_v29 = vld [vmem:[#allocation10 + $0xcc] ss:$16 sps:$4 sm:$0xff]  }
 0x390   : > { %2275 = vmatprep.subr.bf16.mxu0 %v4635_v30  ;;  %2348 = vmatprep.subr.bf16.mxu1 %v4638_v31  ;;  %v5599_v30 = vld [vmem:[#allocation10 + $0xe4] ss:$16 sps:$4 sm:$0xff]   ;;  %v5602_v31 = vld [vmem:[#allocation10 + $0xec] ss:$16 sps:$4 sm:$0xff]  }
 0x393   : > { %2276 = vmatpush1.bf16.msra.mxu0 %v4633_v32  ;;  %2349 = vmatpush1.bf16.msra.mxu1 %v4636_v33  ;;  %v5606_v32 = vld [vmem:[#allocation10 + $0xe0] ss:$16 sps:$4 sm:$0xff]   ;;  %v5610_v33 = vld [vmem:[#allocation10 + $0xe8] ss:$16 sps:$4 sm:$0xff]  }
 0x394   : > { %2277 = vmatprep.subr.bf16.mxu0 %v4641_v34  ;;  %2350 = vmatprep.subr.bf16.mxu1 %v4644_v35 }
 0x397   : > { %2278 = vmatpush1.bf16.msra.mxu0 %v4639_v36  ;;  %2351 = vmatpush1.bf16.msra.mxu1 %v4642_v38 }
 0x398   : > { %2279 = vmatprep.subr.bf16.mxu0 %v4647_v39  ;;  %2352 = vmatprep.subr.bf16.mxu1 %v4650_v40 }
 0x39b   : > { %2280 = vmatpush1.bf16.msra.mxu0 %v4645_v41  ;;  %2353 = vmatpush1.bf16.msra.mxu1 %v4648_v42 }
 0x39c   : > { %2281 = vmatprep.subr.bf16.mxu0 %v4653_v43  ;;  %2354 = vmatprep.subr.bf16.mxu1 %v4656_v44 }
 0x39f   : > { %2282 = vmatpush1.bf16.msra.mxu0 %v4651_v45  ;;  %2355 = vmatpush1.bf16.msra.mxu1 %v4654_v47 }
 0x3a0   : > { %2283 = vmatprep.subr.bf16.mxu0 %v4659_v48  ;;  %2356 = vmatprep.subr.bf16.mxu1 %v4662_v49 }
 0x3a3   : > { %2284 = vmatpush1.bf16.msra.mxu0 %v4657_v50  ;;  %2357 = vmatpush1.bf16.msra.mxu1 %v4660_v51 }
 0x3a4   : > { %2285 = vmatprep.subr.bf16.mxu0 %v4665_v52  ;;  %2358 = vmatprep.subr.bf16.mxu1 %v4668_v60 }
 0x3a7   : > { %2286 = vmatpush1.bf16.msra.mxu0 %v4663_v13  ;;  %2359 = vmatpush1.bf16.msra.mxu1 %v4666_v53 }
 0x3a8   : > { %2697 = vmatprep.subr.bf16.mxu1 %v5521_v18 }
 0x3aa   : > { %2304 = vmatmul.mubr.bf16.vlgmr.msra.gmra.mrb[16].mxu0 %v5395_v4  ;;  %2377 = vmatmul.mubr.bf16.vlgmr.msra.gmra.mrb[16].mxu1 %v5395_v4  ;;  %v5519_v4 = vld [vmem:[#allocation10 + $0x4] ss:$16 sps:$4 sm:$0xff]  }
 0x3ab   : > { %2313 = vmatprep.mubr.bf16.mxu0 %v5009_v6  ;;  %2386 = vmatprep.mubr.bf16.mxu1 %v5009_v6 }
 0x3ac   : > { %2654 = vmatprep.subr.bf16.mxu0 %v5519_v4  ;;  %2698 = vmatpush1.bf16.msra.mxu1 %v5525_v5 }
 0x3ad   : > { %2655 = vmatpush1.bf16.msra.mxu0 %v5523_v10  ;;  %2699 = vmatprep.subr.bf16.mxu1 %v5533_v62 }
 0x3b0   : > { %2700 = vmatpush1.bf16.msra.mxu1 %v5537_v8 }
 0x3b1   : > { %2701 = vmatprep.subr.bf16.mxu1 %v5545_v1 }
 0x3b2   : > { %2314 = vmatmul.mubr.bf16.gmra.mrb[20].mxu0 %v5449_v3  ;;  %2387 = vmatmul.mubr.bf16.gmra.mrb[20].mxu1 %v5449_v3  ;;  %v5531_v3 = vld [vmem:[#allocation10 + $0x24] ss:$16 sps:$4 sm:$0xff]  }
 0x3b3   : > { %2323 = vmatprep.mubr.bf16.mxu0 %v5009_v6  ;;  %2396 = vmatprep.mubr.bf16.mxu1 %v5009_v6 }
 0x3b4   : > { %2656 = vmatprep.subr.bf16.mxu0 %v5531_v3  ;;  %2702 = vmatpush1.bf16.msra.mxu1 %v5549_v17 }
 0x3b5   : > { %2657 = vmatpush1.bf16.msra.mxu0 %v5535_v2  ;;  %2703 = vmatprep.subr.bf16.mxu1 %v5555_v37 }
 0x3b6   : > { %2658 = vmatprep.subr.bf16.mxu0 %v5543_v14 }
 0x3b8   : > { %2704 = vmatpush1.bf16.msra.mxu1 %v5561_v46 }
 0x3b9   : > { %2659 = vmatpush1.bf16.msra.mxu0 %v5547_v16  ;;  %2705 = vmatprep.subr.bf16.mxu1 %v5567_v0 }
 0x3ba   : > { %2324 = vmatmul.mubr.bf16.gmra.mrb[24].mxu0 %v5501_v25  ;;  %2397 = vmatmul.mubr.bf16.gmra.mrb[24].mxu1 %v5501_v25  ;;  %v5585_v25 = vld [vmem:[#allocation10 + $0xa8] ss:$16 sps:$4 sm:$0xff]  }
 0x3bb   : > { %2333 = vmatprep.mubr.bf16.mxu0 %v5009_v6  ;;  %2406 = vmatprep.mubr.bf16.mxu1 %v5009_v6 }
 0x3bc   : > { %2660 = vmatprep.subr.bf16.mxu0 %v5553_v15  ;;  %2706 = vmatpush1.bf16.msra.mxu1 %v5573_v21 }
 0x3bd   : > { %2661 = vmatpush1.bf16.msra.mxu0 %v5559_v56  ;;  %2707 = vmatprep.subr.bf16.mxu1 %v5579_v23 }
 0x3be   : > { %2662 = vmatprep.subr.bf16.mxu0 %v5565_v61 }
 0x3c0   : > { %2708 = vmatpush1.bf16.msra.mxu1 %v5585_v25 }
 0x3c1   : > { %2663 = vmatpush1.bf16.msra.mxu0 %v5571_v20  ;;  %2709 = vmatprep.subr.bf16.mxu1 %v5597_v29 }
 0x3c2   : > { %2664 = vmatprep.subr.bf16.mxu0 %v5577_v22 }
 0x3c4   : > { %2710 = vmatpush1.bf16.msra.mxu1 %v5595_v27 }
 0x3c5   : > { %2665 = vmatpush1.bf16.msra.mxu0 %v5583_v24  ;;  %2711 = vmatprep.subr.bf16.mxu1 %v5602_v31 }
 0x3c6   : > { %2666 = vmatprep.subr.bf16.mxu0 %v5593_v26 }
 0x3c8   : > { %2712 = vmatpush1.bf16.msra.mxu1 %v5610_v33 }
 0x3c9   : > { %2667 = vmatpush1.bf16.msra.mxu0 %v5591_v12  ;;  %3034 = vmatprep.subr.bf16.mxu1 %v5521_v18 }
 0x3ca   : > { %2668 = vmatprep.subr.bf16.mxu0 %v5599_v30 }
 0x3cd   : > { %2669 = vmatpush1.bf16.msra.mxu0 %v5606_v32 }
 0x3ce   : > { %2991 = vmatprep.subr.bf16.mxu0 %v5519_v4 }
 0x45d   : > { %v1951_v34 = vpop.f32.mrb[12].mxu0  ;;  %v1994_v35 = vpop.f32.mrb[12].mxu1 }
 0x45e   : > { %v4389_v36 = vadd.f32 %v1951_v34, %v5366_v58  ;;  %v1953_v38 = vpop.f32.mrb[13].mxu0  ;;  %v1996_v39 = vpop.f32.mrb[13].mxu1  ;;  %v4405_v50 = vadd.f32 %v1994_v35, %v5375_v63 }
 0x45f   : > { %v4390_v40 = vadd.f32 %v1953_v38, %v5370_v59  ;;  %v1955_v41 = vpop.f32.mrb[14].mxu0  ;;  %v1998_v42 = vpop.f32.mrb[14].mxu1  ;;  %v4406_v13 = vadd.f32 %v1996_v39, %v5384_v19 }
 0x460   : > { %v2011_v43 = vmul.f32 0.5, %v4389_v36  ;;  %v4391_v44 = vadd.f32 %v1955_v41, %v5366_v58  ;;  %v1957_v45 = vpop.f32.mrb[15].mxu0  ;;  %v2000_v47 = vpop.f32.mrb[15].mxu1  ;;  %v4407_v60 = vadd.f32 %v1998_v42, %v5375_v63 }
 0x461   : > { %v2019_v48 = vmul.f32 0.5, %v4390_v40  ;;  %v4392_v49 = vadd.f32 %v1957_v45, %v5370_v59  ;;  %v2029_v58 = vmul.f32 0.5, %v4406_v13  ;;  %v4408_v53 = vadd.f32 %v2000_v47, %v5384_v19 }
 0x462   : > { %4777 = vtanh.f32 %v2011_v43  ;;  %v2012_v51 = vmul.f32 0.5, %v4391_v44 }
 0x463   : > { %4779 = vtanh.f32 %v2019_v48  ;;  %v2020_v52 = vmul.f32 0.5, %v4392_v49  ;;  %v2030_v35 = vmul.f32 0.5, %v4408_v53 }
 0x464   : > { %4781 = vtanh.f32 %v2012_v51 }
 0x465   : > { %4783 = vtanh.f32 %v4405_v50 }
 0x466   : > { %4785 = vtanh.f32 %v2020_v52 }
 0x467   : > { %4787 = vtanh.f32 %v4407_v60 }
 0x468   : > { %4789 = vtanh.f32 %v2029_v58 }
 0x469   : > { %4791 = vtanh.f32 %v2030_v35 }
 0x46c   : > { %v4778_v34 = vpop.eup %4777 }
 0x46d   : > { %v4780_v36 = vpop.eup %4779  ;;  %v2015_v59 = vmul.f32 0.5, %v4778_v34 }
 0x46e   : > { %v2023_v38 = vmul.f32 0.5, %v4780_v36  ;;  %v4782_v40 = vpop.eup %4781 }
 0x46f   : > { %v2017_v41 = vadd.f32 0.5, %v2015_v59  ;;  %v4784_v43 = vpop.eup %4783  ;;  %v2016_v45 = vmul.f32 0.5, %v4782_v40 }
 0x470   : > { %v2025_v44 = vadd.f32 0.5, %v2023_v38  ;;  %v4786_v63 = vpop.eup %4785 }
 0x471   : > { %v2039_v42 = vmul.f32 %v4784_v43, %v2017_v41  ;;  %v2018_v48 = vadd.f32 0.5, %v2016_v45  ;;  %v2024_v49 = vmul.f32 0.5, %v4786_v63  ;;  %v4788_v50 = vpop.eup %4787  ;;  %v2089_v43 = vld [vmem:[%s5851_s6] sm:$0xf] }
 0x472   : > { %v2037_v39 = vmul.f32 %v2025_v44, %v5494_v9  ;;  %v4790_v60 = vpop.eup %4789  ;;  %v5668_v44 = vrot.slane %v2089_v43, %v435_v54  ;;  %v5672_v45 = vrot.slane %v2089_v43, %v439_v55 }
 0x473   : > { %v2026_v47 = vadd.f32 0.5, %v2024_v49  ;;  %v2040_v51 = vmul.f32 %v4788_v50, %v2018_v48  ;;  %v2033_v58 = vmul.f32 0.5, %v4790_v60  ;;  %v4792_v53 = vpop.eup %4791  ;;  %v5677_v48 = vrot.slane %v2089_v43, %v443_v57 }
 0x474   : > { %v2041_v19 = vadd.f32 %v2039_v42, %v2037_v39  ;;  %v2034_v36 = vmul.f32 0.5, %v4792_v53 }
 0x475   : > { %v2038_v52 = vmul.f32 %v2026_v47, %v5498_v28  ;;  %v2035_v34 = vadd.f32 0.5, %v2033_v58  ;;  %v2450_v28 = vld [vmem:[#allocation4 + $0x8] sm:$0xff] }
 0x476   : > { %4793 = vtanh.f32 %v2041_v19  ;;  %2049 = vst [vmem:[#allocation5] sm:$0xff] %v2041_v19  ;;  %v2036_v38 = vadd.f32 0.5, %v2034_v36  ;;  %v5685_v36 = vrot.slane %v2089_v43, %v447_v11  ;;  %v2452_v11 = vld [vmem:[#allocation5 + $0x10] sm:$0xff] }
 0x477   : > { %v2042_v13 = vadd.f32 %v2040_v51, %v2038_v52 }
 0x479   : > { %4795 = vtanh.f32 %v2042_v13  ;;  %2050 = vst [vmem:[#allocation5 + $0x8] sm:$0xff] %v2042_v13 }
 0x480   : > { %v4794_v9 = vpop.eup %4793 }
 0x481   : > { %v2045_v59 = vmul.f32 %v4794_v9, %v2035_v34 }
 0x483   : > { %v4796_v35 = vpop.eup %4795 }
 0x484   : > { %v2046_v40 = vmul.f32 %v4796_v35, %v2036_v38 }
 0x486   : > { %v2047_v41 = vpack.c.bf16 %v2046_v40, %v2045_v59 }
 0x488   : > { %2048 = vst [vmem:[#allocation4] sm:$0xff] %v2047_v41  ;;  %2334 = vmatmul.mubr.bf16.gmra.mrb[28].mxu0 %v2047_v41  ;;  %2407 = vmatmul.mubr.bf16.gmra.mrb[28].mxu1 %v2047_v41 }
 0x489   : > { %2686 = vmatprep.mubr.bf16.mxu0 %v5009_v6  ;;  %2729 = vmatprep.mubr.bf16.mxu1 %v5009_v6 }
 0x490   : > { %2687 = vmatmul.mubr.bf16.vlgmr.msra.gmra.mrb[16].mxu0 %v2450_v28  ;;  %2730 = vmatmul.mubr.bf16.vlgmr.msra.gmra.mrb[16].mxu1 %v2450_v28 }
 0x491   : > { %2992 = vmatpush1.bf16.msra.mxu0 %v5523_v10  ;;  %3035 = vmatpush1.bf16.msra.mxu1 %v5525_v5 }
 0x492   : > { %2993 = vmatprep.subr.bf16.mxu0 %v5531_v3  ;;  %3036 = vmatprep.subr.bf16.mxu1 %v5533_v62 }
 0x493   : > { %3023 = vmatprep.mubr.bf16.mxu0 %v5009_v6  ;;  %3066 = vmatprep.mubr.bf16.mxu1 %v5009_v6 }
 0x495   : > { %2994 = vmatpush1.bf16.msra.mxu0 %v5535_v2  ;;  %3037 = vmatpush1.bf16.msra.mxu1 %v5537_v8 }
 0x496   : > { %2995 = vmatprep.subr.bf16.mxu0 %v5543_v14  ;;  %3038 = vmatprep.subr.bf16.mxu1 %v5545_v1 }
 0x499   : > { %2996 = vmatpush1.bf16.msra.mxu0 %v5547_v16  ;;  %3039 = vmatpush1.bf16.msra.mxu1 %v5549_v17 }
 0x49a   : > { %2997 = vmatprep.subr.bf16.mxu0 %v5553_v15  ;;  %3040 = vmatprep.subr.bf16.mxu1 %v5555_v37 }
 0x49d   : > { %2998 = vmatpush1.bf16.msra.mxu0 %v5559_v56  ;;  %3041 = vmatpush1.bf16.msra.mxu1 %v5561_v46 }
 0x49e   : > { %2999 = vmatprep.subr.bf16.mxu0 %v5565_v61  ;;  %3042 = vmatprep.subr.bf16.mxu1 %v5567_v0 }
 0x4a1   : > { %3000 = vmatpush1.bf16.msra.mxu0 %v5571_v20  ;;  %3043 = vmatpush1.bf16.msra.mxu1 %v5573_v21 }
 0x4a2   : > { %3001 = vmatprep.subr.bf16.mxu0 %v5577_v22  ;;  %3044 = vmatprep.subr.bf16.mxu1 %v5579_v23 }
 0x4a5   : > { %3002 = vmatpush1.bf16.msra.mxu0 %v5583_v24  ;;  %3045 = vmatpush1.bf16.msra.mxu1 %v5585_v25 }
 0x4a6   : > { %3003 = vmatprep.subr.bf16.mxu0 %v5593_v26  ;;  %3046 = vmatprep.subr.bf16.mxu1 %v5597_v29 }
 0x4a9   : > { %3004 = vmatpush1.bf16.msra.mxu0 %v5591_v12  ;;  %3047 = vmatpush1.bf16.msra.mxu1 %v5595_v27 }
 0x4aa   : > { %3005 = vmatprep.subr.bf16.mxu0 %v5599_v30  ;;  %3048 = vmatprep.subr.bf16.mxu1 %v5602_v31 }
 0x4ad   : > { %3006 = vmatpush1.bf16.msra.mxu0 %v5606_v32  ;;  %3049 = vmatpush1.bf16.msra.mxu1 %v5610_v33 }
 0x4ae   : > { %3328 = vmatprep.subr.bf16.mxu0 %v5519_v4  ;;  %3371 = vmatprep.subr.bf16.mxu1 %v5521_v18 }
 0x563   : > { %v2688_v63 = vpop.f32.mrb[16].mxu0  ;;  %v2731_v42 = vpop.f32.mrb[16].mxu1 }
 0x564   : > { %v4409_v39 = vadd.f32 %v2688_v63, %v5668_v44  ;;  %v2690_v49 = vpop.f32.mrb[17].mxu0  ;;  %v2733_v50 = vpop.f32.mrb[17].mxu1  ;;  %v4425_v53 = vadd.f32 %v2731_v42, %v5677_v48 }
 0x565   : > { %v4410_v19 = vadd.f32 %v2690_v49, %v5672_v45  ;;  %v2692_v47 = vpop.f32.mrb[18].mxu0  ;;  %v2735_v51 = vpop.f32.mrb[18].mxu1  ;;  %v4426_v59 = vadd.f32 %v2733_v50, %v5685_v36 }
 0x566   : > { %v2748_v54 = vmul.f32 0.5, %v4409_v39  ;;  %v4411_v52 = vadd.f32 %v2692_v47, %v5668_v44  ;;  %v2694_v60 = vpop.f32.mrb[19].mxu0  ;;  %v2737_v55 = vpop.f32.mrb[19].mxu1  ;;  %v4427_v9 = vadd.f32 %v2735_v51, %v5677_v48 }
 0x567   : > { %v2756_v13 = vmul.f32 0.5, %v4410_v19  ;;  %v4412_v58 = vadd.f32 %v2694_v60, %v5672_v45  ;;  %v4428_v38 = vadd.f32 %v2737_v55, %v5685_v36  ;;  %v2766_v28 = vmul.f32 0.5, %v4426_v59  ;;  %v2453_v55 = vld [vmem:[#allocation5 + $0x18] sm:$0xff] }
 0x568   : > { %4797 = vtanh.f32 %v2748_v54  ;;  %v2749_v34 = vmul.f32 0.5, %v4411_v52 }
 0x569   : > { %4799 = vtanh.f32 %v2756_v13  ;;  %v2757_v57 = vmul.f32 0.5, %v4412_v58  ;;  %v2767_v42 = vmul.f32 0.5, %v4428_v38 }
 0x56a   : > { %4801 = vtanh.f32 %v2749_v34 }
 0x56b   : > { %4803 = vtanh.f32 %v4425_v53 }
 0x56c   : > { %4805 = vtanh.f32 %v2757_v57 }
 0x56d   : > { %4807 = vtanh.f32 %v4427_v9 }
 0x56e   : > { %4809 = vtanh.f32 %v2766_v28 }
 0x56f   : > { %4811 = vtanh.f32 %v2767_v42 }
 0x572   : > { %v4798_v35 = vpop.eup %4797 }
 0x573   : > { %v4800_v40 = vpop.eup %4799  ;;  %v2752_v41 = vmul.f32 0.5, %v4798_v35 }
 0x574   : > { %v2760_v63 = vmul.f32 0.5, %v4800_v40  ;;  %v4802_v39 = vpop.eup %4801 }
 0x575   : > { %v2754_v7 = vadd.f32 0.5, %v2752_v41  ;;  %v4804_v43 = vpop.eup %4803  ;;  %v2753_v19 = vmul.f32 0.5, %v4802_v39 }
 0x576   : > { %v2762_v49 = vadd.f32 0.5, %v2760_v63  ;;  %v4806_v47 = vpop.eup %4805 }
 0x577   : > { %v2776_v51 = vmul.f32 %v4804_v43, %v2754_v7  ;;  %v2755_v50 = vadd.f32 0.5, %v2753_v19  ;;  %v2761_v52 = vmul.f32 0.5, %v4806_v47  ;;  %v4808_v60 = vpop.eup %4807 }
 0x578   : > { %v2774_v54 = vmul.f32 %v2762_v49, %v2452_v11  ;;  %v4810_v9 = vpop.eup %4809 }
 0x579   : > { %v2763_v58 = vadd.f32 0.5, %v2761_v52  ;;  %v2777_v53 = vmul.f32 %v4808_v60, %v2755_v50  ;;  %v4812_v59 = vpop.eup %4811  ;;  %v2770_v38 = vmul.f32 0.5, %v4810_v9 }
 0x57a   : > { %v5690_v13 = vadd.f32 %v2776_v51, %v2774_v54  ;;  %v2771_v35 = vmul.f32 0.5, %v4812_v59 }
 0x57b   : > { %v2775_v34 = vmul.f32 %v2763_v58, %v2453_v55  ;;  %v2772_v41 = vadd.f32 0.5, %v2770_v38 }
 0x57c   : > { %4813 = vtanh.f32 %v5690_v13  ;;  %v2773_v28 = vadd.f32 0.5, %v2771_v35 }
 0x57d   : > { %v5693_v57 = vadd.f32 %v2777_v53, %v2775_v34 }
 0x57f   : > { %4815 = vtanh.f32 %v5693_v57 }
 0x586   : > { %v4814_v40 = vpop.eup %4813 }
 0x587   : > { %v2782_v42 = vmul.f32 %v4814_v40, %v2772_v41 }
 0x589   : > { %v4816_v63 = vpop.eup %4815 }
 0x58a   : > { %v2783_v39 = vmul.f32 %v4816_v63, %v2773_v28 }
 0x58c   : > { %v2784_v7 = vpack.c.bf16 %v2783_v39, %v2782_v42 }
 0x58e   : > { %3024 = vmatmul.mubr.bf16.vlgmr.msra.gmra.mrb[20].mxu0 %v2784_v7  ;;  %3067 = vmatmul.mubr.bf16.vlgmr.msra.gmra.mrb[20].mxu1 %v2784_v7 }
 0x58f   : > { %3329 = vmatpush1.bf16.msra.mxu0 %v5523_v10  ;;  %3372 = vmatpush1.bf16.msra.mxu1 %v5525_v5 }
 0x590   : > { %3330 = vmatprep.subr.bf16.mxu0 %v5531_v3  ;;  %3373 = vmatprep.subr.bf16.mxu1 %v5533_v62 }
 0x591   : > { %3360 = vmatprep.mubr.bf16.mxu0 %v5009_v6  ;;  %3403 = vmatprep.mubr.bf16.mxu1 %v5009_v6 }
 0x593   : > { %3331 = vmatpush1.bf16.msra.mxu0 %v5535_v2  ;;  %3374 = vmatpush1.bf16.msra.mxu1 %v5537_v8 }
 0x594   : > { %3332 = vmatprep.subr.bf16.mxu0 %v5543_v14  ;;  %3375 = vmatprep.subr.bf16.mxu1 %v5545_v1 }
 0x597   : > { %3333 = vmatpush1.bf16.msra.mxu0 %v5547_v16  ;;  %3376 = vmatpush1.bf16.msra.mxu1 %v5549_v17 }
 0x598   : > { %3334 = vmatprep.subr.bf16.mxu0 %v5553_v15  ;;  %3377 = vmatprep.subr.bf16.mxu1 %v5555_v37 }
 0x59b   : > { %3335 = vmatpush1.bf16.msra.mxu0 %v5559_v56  ;;  %3378 = vmatpush1.bf16.msra.mxu1 %v5561_v46 }
 0x59c   : > { %3336 = vmatprep.subr.bf16.mxu0 %v5565_v61  ;;  %3379 = vmatprep.subr.bf16.mxu1 %v5567_v0 }
 0x59f   : > { %3337 = vmatpush1.bf16.msra.mxu0 %v5571_v20  ;;  %3380 = vmatpush1.bf16.msra.mxu1 %v5573_v21 }
 0x5a0   : > { %3338 = vmatprep.subr.bf16.mxu0 %v5577_v22  ;;  %3381 = vmatprep.subr.bf16.mxu1 %v5579_v23 }
 0x5a3   : > { %3339 = vmatpush1.bf16.msra.mxu0 %v5583_v24  ;;  %3382 = vmatpush1.bf16.msra.mxu1 %v5585_v25 }
 0x5a4   : > { %3340 = vmatprep.subr.bf16.mxu0 %v5593_v26  ;;  %3383 = vmatprep.subr.bf16.mxu1 %v5597_v29 }
 0x5a7   : > { %3341 = vmatpush1.bf16.msra.mxu0 %v5591_v12  ;;  %3384 = vmatpush1.bf16.msra.mxu1 %v5595_v27 }
 0x5a8   : > { %3342 = vmatprep.subr.bf16.mxu0 %v5599_v30  ;;  %3385 = vmatprep.subr.bf16.mxu1 %v5602_v31 }
 0x5ab   : > { %3343 = vmatpush1.bf16.msra.mxu0 %v5606_v32  ;;  %3386 = vmatpush1.bf16.msra.mxu1 %v5610_v33 }
 0x5ac   : > { %3665 = vmatprep.subr.bf16.mxu0 %v5519_v4  ;;  %3708 = vmatprep.subr.bf16.mxu1 %v5521_v18 }
 0x661   : > { %v3025_v11 = vpop.f32.mrb[20].mxu0  ;;  %v3068_v43 = vpop.f32.mrb[20].mxu1 }
 0x662   : > { %v4413_v49 = vadd.f32 %v3025_v11, %v5668_v44  ;;  %v3027_v19 = vpop.f32.mrb[21].mxu0  ;;  %v3070_v47 = vpop.f32.mrb[21].mxu1  ;;  %v4429_v18 = vadd.f32 %v3068_v43, %v5677_v48 }
 0x663   : > { %v4414_v51 = vadd.f32 %v3027_v19, %v5672_v45  ;;  %v3029_v54 = vpop.f32.mrb[22].mxu0  ;;  %v3072_v50 = vpop.f32.mrb[22].mxu1  ;;  %v4430_v38 = vadd.f32 %v3070_v47, %v5685_v36 }
 0x664   : > { %v3085_v52 = vmul.f32 0.5, %v4413_v49  ;;  %v4415_v60 = vadd.f32 %v3029_v54, %v5668_v44  ;;  %v3031_v55 = vpop.f32.mrb[23].mxu0  ;;  %v3074_v58 = vpop.f32.mrb[23].mxu1  ;;  %v4431_v59 = vadd.f32 %v3072_v50, %v5677_v48 }
 0x665   : > { %v3093_v53 = vmul.f32 0.5, %v4414_v51  ;;  %v4416_v4 = vadd.f32 %v3031_v55, %v5672_v45  ;;  %v4432_v35 = vadd.f32 %v3074_v58, %v5685_v36  ;;  %v3103_v63 = vmul.f32 0.5, %v4430_v38 }
 0x666   : > { %4817 = vtanh.f32 %v3085_v52  ;;  %v3086_v34 = vmul.f32 0.5, %v4415_v60 }
 0x667   : > { %4819 = vtanh.f32 %v3093_v53  ;;  %v3094_v9 = vmul.f32 0.5, %v4416_v4  ;;  %v3104_v39 = vmul.f32 0.5, %v4432_v35 }
 0x668   : > { %4821 = vtanh.f32 %v3086_v34 }
 0x669   : > { %4823 = vtanh.f32 %v4429_v18 }
 0x66a   : > { %4825 = vtanh.f32 %v3094_v9 }
 0x66b   : > { %4827 = vtanh.f32 %v4431_v59 }
 0x66c   : > { %4829 = vtanh.f32 %v3103_v63 }
 0x66d   : > { %4831 = vtanh.f32 %v3104_v39 }
 0x670   : > { %v4818_v40 = vpop.eup %4817 }
 0x671   : > { %v4820_v41 = vpop.eup %4819  ;;  %v3089_v28 = vmul.f32 0.5, %v4818_v40 }
 0x672   : > { %v3097_v42 = vmul.f32 0.5, %v4820_v41  ;;  %v4822_v7 = vpop.eup %4821 }
 0x673   : > { %v3091_v11 = vadd.f32 0.5, %v3089_v28  ;;  %v4824_v43 = vpop.eup %4823  ;;  %v3090_v19 = vmul.f32 0.5, %v4822_v7 }
 0x674   : > { %v3099_v49 = vadd.f32 0.5, %v3097_v42  ;;  %v4826_v51 = vpop.eup %4825 }
 0x675   : > { %v3113_v54 = vmul.f32 %v4824_v43, %v3091_v11  ;;  %v3092_v47 = vadd.f32 0.5, %v3090_v19  ;;  %v3098_v52 = vmul.f32 0.5, %v4826_v51  ;;  %v4828_v60 = vpop.eup %4827 }
 0x676   : > { %v3111_v50 = vmul.f32 %v3099_v49, %v5690_v13  ;;  %v4830_v34 = vpop.eup %4829 }
 0x677   : > { %v3100_v58 = vadd.f32 0.5, %v3098_v52  ;;  %v3114_v53 = vmul.f32 %v4828_v60, %v3092_v47  ;;  %v4832_v9 = vpop.eup %4831  ;;  %v3107_v59 = vmul.f32 0.5, %v4830_v34 }
 0x678   : > { %v5739_v55 = vadd.f32 %v3113_v54, %v3111_v50  ;;  %v3108_v13 = vmul.f32 0.5, %v4832_v9 }
 0x679   : > { %v3112_v4 = vmul.f32 %v3100_v58, %v5693_v57  ;;  %v3109_v35 = vadd.f32 0.5, %v3107_v59 }
 0x67a   : > { %4833 = vtanh.f32 %v5739_v55  ;;  %v3110_v40 = vadd.f32 0.5, %v3108_v13 }
 0x67b   : > { %v5743_v18 = vadd.f32 %v3114_v53, %v3112_v4 }
 0x67d   : > { %4835 = vtanh.f32 %v5743_v18 }
 0x684   : > { %v4834_v38 = vpop.eup %4833 }
 0x685   : > { %v3119_v28 = vmul.f32 %v4834_v38, %v3109_v35 }
 0x687   : > { %v4836_v41 = vpop.eup %4835 }
 0x688   : > { %v3120_v63 = vmul.f32 %v4836_v41, %v3110_v40 }
 0x68a   : > { %v3121_v42 = vpack.c.bf16 %v3120_v63, %v3119_v28 }
 0x68c   : > { %3361 = vmatmul.mubr.bf16.vlgmr.msra.gmra.mrb[24].mxu0 %v3121_v42  ;;  %3404 = vmatmul.mubr.bf16.vlgmr.msra.gmra.mrb[24].mxu1 %v3121_v42 }
 0x68d   : > { %3666 = vmatpush1.bf16.msra.mxu0 %v5523_v10  ;;  %3709 = vmatpush1.bf16.msra.mxu1 %v5525_v5 }
 0x68e   : > { %3667 = vmatprep.subr.bf16.mxu0 %v5531_v3  ;;  %3710 = vmatprep.subr.bf16.mxu1 %v5533_v62 }
 0x68f   : > { %3697 = vmatprep.mubr.bf16.mxu0 %v5009_v6  ;;  %3740 = vmatprep.mubr.bf16.mxu1 %v5009_v6 }
 0x691   : > { %3668 = vmatpush1.bf16.msra.mxu0 %v5535_v2  ;;  %3711 = vmatpush1.bf16.msra.mxu1 %v5537_v8 }
 0x692   : > { %3669 = vmatprep.subr.bf16.mxu0 %v5543_v14  ;;  %3712 = vmatprep.subr.bf16.mxu1 %v5545_v1 }
 0x695   : > { %3670 = vmatpush1.bf16.msra.mxu0 %v5547_v16  ;;  %3713 = vmatpush1.bf16.msra.mxu1 %v5549_v17 }
 0x696   : > { %3671 = vmatprep.subr.bf16.mxu0 %v5553_v15  ;;  %3714 = vmatprep.subr.bf16.mxu1 %v5555_v37 }
 0x699   : > { %3672 = vmatpush1.bf16.msra.mxu0 %v5559_v56  ;;  %3715 = vmatpush1.bf16.msra.mxu1 %v5561_v46 }
 0x69a   : > { %3673 = vmatprep.subr.bf16.mxu0 %v5565_v61  ;;  %3716 = vmatprep.subr.bf16.mxu1 %v5567_v0 }
 0x69d   : > { %3674 = vmatpush1.bf16.msra.mxu0 %v5571_v20  ;;  %3717 = vmatpush1.bf16.msra.mxu1 %v5573_v21 }
 0x69e   : > { %3675 = vmatprep.subr.bf16.mxu0 %v5577_v22  ;;  %3718 = vmatprep.subr.bf16.mxu1 %v5579_v23 }
 0x6a1   : > { %3676 = vmatpush1.bf16.msra.mxu0 %v5583_v24  ;;  %3719 = vmatpush1.bf16.msra.mxu1 %v5585_v25 }
 0x6a2   : > { %3677 = vmatprep.subr.bf16.mxu0 %v5593_v26  ;;  %3720 = vmatprep.subr.bf16.mxu1 %v5597_v29 }
 0x6a5   : > { %3678 = vmatpush1.bf16.msra.mxu0 %v5591_v12  ;;  %3721 = vmatpush1.bf16.msra.mxu1 %v5595_v27 }
 0x6a6   : > { %3679 = vmatprep.subr.bf16.mxu0 %v5599_v30  ;;  %3722 = vmatprep.subr.bf16.mxu1 %v5602_v31 }
 0x6a9   : > { %3680 = vmatpush1.bf16.msra.mxu0 %v5606_v32  ;;  %3723 = vmatpush1.bf16.msra.mxu1 %v5610_v33 }
 0x75f   : > { %v3362_v6 = vpop.f32.mrb[24].mxu0  ;;  %v3405_v10 = vpop.f32.mrb[24].mxu1 }
 0x760   : > { %v4417_v5 = vadd.f32 %v3362_v6, %v5668_v44  ;;  %v3364_v3 = vpop.f32.mrb[25].mxu0  ;;  %v3407_v62 = vpop.f32.mrb[25].mxu1  ;;  %v4433_v46 = vadd.f32 %v3405_v10, %v5677_v48 }
 0x761   : > { %v4418_v2 = vadd.f32 %v3364_v3, %v5672_v45  ;;  %v3366_v8 = vpop.f32.mrb[26].mxu0  ;;  %v3409_v14 = vpop.f32.mrb[26].mxu1  ;;  %v4434_v21 = vadd.f32 %v3407_v62, %v5685_v36 }
 0x762   : > { %v3422_v1 = vmul.f32 0.5, %v4417_v5  ;;  %v4419_v16 = vadd.f32 %v3366_v8, %v5668_v44  ;;  %v3368_v17 = vpop.f32.mrb[27].mxu0  ;;  %v3411_v15 = vpop.f32.mrb[27].mxu1  ;;  %v4435_v20 = vadd.f32 %v3409_v14, %v5677_v48 }
 0x763   : > { %v3430_v37 = vmul.f32 0.5, %v4418_v2  ;;  %v4420_v56 = vadd.f32 %v3368_v17, %v5672_v45  ;;  %v4436_v22 = vadd.f32 %v3411_v15, %v5685_v36  ;;  %v3440_v12 = vmul.f32 0.5, %v4434_v21 }
 0x764   : > { %4837 = vtanh.f32 %v3422_v1  ;;  %v3423_v61 = vmul.f32 0.5, %v4419_v16 }
 0x765   : > { %4839 = vtanh.f32 %v3430_v37  ;;  %v3431_v0 = vmul.f32 0.5, %v4420_v56  ;;  %v3441_v27 = vmul.f32 0.5, %v4436_v22 }
 0x766   : > { %4841 = vtanh.f32 %v3423_v61 }
 0x767   : > { %4843 = vtanh.f32 %v4433_v46 }
 0x768   : > { %4845 = vtanh.f32 %v3431_v0 }
 0x769   : > { %4847 = vtanh.f32 %v4435_v20 }
 0x76a   : > { %4849 = vtanh.f32 %v3440_v12 }
 0x76b   : > { %4851 = vtanh.f32 %v3441_v27 }
 0x76e   : > { %v4838_v23 = vpop.eup %4837 }
 0x76f   : > { %v4840_v24 = vpop.eup %4839  ;;  %v3426_v25 = vmul.f32 0.5, %v4838_v23 }
 0x770   : > { %v3434_v26 = vmul.f32 0.5, %v4840_v24  ;;  %v4842_v29 = vpop.eup %4841 }
 0x771   : > { %v3428_v30 = vadd.f32 0.5, %v3426_v25  ;;  %v4844_v31 = vpop.eup %4843  ;;  %v3427_v33 = vmul.f32 0.5, %v4842_v29 }
 0x772   : > { %v3436_v32 = vadd.f32 0.5, %v3434_v26  ;;  %v4846_v57 = vpop.eup %4845 }
 0x773   : > { %v3450_v39 = vmul.f32 %v4844_v31, %v3428_v30  ;;  %v3429_v11 = vadd.f32 0.5, %v3427_v33  ;;  %v3435_v43 = vmul.f32 0.5, %v4846_v57  ;;  %v4848_v49 = vpop.eup %4847 }
 0x774   : > { %v3448_v7 = vmul.f32 %v3436_v32, %v5739_v55  ;;  %v4850_v52 = vpop.eup %4849 }
 0x775   : > { %v3437_v51 = vadd.f32 0.5, %v3435_v43  ;;  %v3451_v54 = vmul.f32 %v4848_v49, %v3429_v11  ;;  %v4852_v60 = vpop.eup %4851  ;;  %v3444_v58 = vmul.f32 0.5, %v4850_v52 }
 0x776   : > { %v3452_v19 = vadd.f32 %v3450_v39, %v3448_v7  ;;  %v3445_v53 = vmul.f32 0.5, %v4852_v60  ;;  %v5010_v60 = vmov (!%p4333_p10), 0.0  }
 0x777   : > { %v3449_v50 = vmul.f32 %v3437_v51, %v5743_v18  ;;  %v3446_v55 = vadd.f32 0.5, %v3444_v58  ;;  %4357 = vmatprep.subr.bf16.mxu0 (!%p4333_p10), %v5010_v60  ;;  %v4878_v58 = vld [vmem:[%s5852_s7 + $0x8] sm:$0xff] (!%p4333_p10)  }
 0x778   : > { %4853 = vtanh.f32 %v3452_v19  ;;  %v3447_v34 = vadd.f32 0.5, %v3445_v53  ;;  %v4879_v53 = vld [vmem:[%s5852_s7 + $0x10] sm:$0xff] (!%p4333_p10)  }
 0x779   : > { %v5788_v47 = vadd.f32 %v3451_v54, %v3449_v50 }
 0x77b   : > { %4855 = vtanh.f32 %v5788_v47 }
 0x782   : > { %v4854_v4 = vpop.eup %4853 }
 0x783   : > { %v3456_v59 = vmul.f32 %v4854_v4, %v3446_v55  ;;  %v4880_v4 = vld [vmem:[%s5852_s7 + $0x18] sm:$0xff] (!%p4333_p10)   ;;  %v4881_v55 = vld [vmem:[%s5852_s7 + $0x20] sm:$0xff] (!%p4333_p10)  }
 0x785   : > { %v4856_v9 = vpop.eup %4855 }
 0x786   : > { %v3457_v13 = vmul.f32 %v4856_v9, %v3447_v34  ;;  %v4882_v34 = vld [vmem:[%s5852_s7 + $0x28] sm:$0xff] (!%p4333_p10)   ;;  %v4883_v9 = vld [vmem:[%s5852_s7 + $0x30] sm:$0xff] (!%p4333_p10)  }
 0x788   : > { %v3458_v38 = vpack.c.bf16 %v3457_v13, %v3456_v59  ;;  %v4884_v59 = vld [vmem:[%s5852_s7 + $0x38] sm:$0xff] (!%p4333_p10)  }
 0x78a   : > { %3698 = vmatmul.mubr.bf16.vlgmr.msra.gmra.mrb[28].mxu0 %v3458_v38  ;;  %3741 = vmatmul.mubr.bf16.vlgmr.msra.gmra.mrb[28].mxu1 %v3458_v38  ;;  %v4334_v38 = vld [vmem:[%s5853_s8] ss:$0 sm:$0xff] (!%p4333_p10) }
 0x78b   : > { %4373 = vmatprep.mubr.msk.bf16.mxu0 (!%p4333_p10), %vm5011_vm2, %v5010_v60 }
 0x85d   : > { %v3699_v35 = vpop.f32.mrb[28].mxu0  ;;  %v3742_v18 = vpop.f32.mrb[28].mxu1 }
 0x85e   : > { %v4421_v40 = vadd.f32 %v3699_v35, %v5668_v44  ;;  %v3701_v41 = vpop.f32.mrb[29].mxu0  ;;  %v3744_v28 = vpop.f32.mrb[29].mxu1  ;;  %v4437_v14 = vadd.f32 %v3742_v18, %v5677_v48 }
 0x85f   : > { %v4422_v63 = vadd.f32 %v3701_v41, %v5672_v45  ;;  %v3703_v42 = vpop.f32.mrb[30].mxu0  ;;  %v3746_v6 = vpop.f32.mrb[30].mxu1  ;;  %v4438_v15 = vadd.f32 %v3744_v28, %v5685_v36 }
 0x860   : > { %v3759_v10 = vmul.f32 0.5, %v4421_v40  ;;  %v4423_v5 = vadd.f32 %v3703_v42, %v5668_v44  ;;  %v3705_v3 = vpop.f32.mrb[31].mxu0  ;;  %v3748_v62 = vpop.f32.mrb[31].mxu1  ;;  %v4439_v17 = vadd.f32 %v3746_v6, %v5677_v48 }
 0x861   : > { %v3767_v2 = vmul.f32 0.5, %v4422_v63  ;;  %v4424_v8 = vadd.f32 %v3705_v3, %v5672_v45  ;;  %v3777_v44 = vmul.f32 0.5, %v4438_v15  ;;  %v4440_v37 = vadd.f32 %v3748_v62, %v5685_v36 }
 0x862   : > { %4857 = vtanh.f32 %v3759_v10  ;;  %v3760_v1 = vmul.f32 0.5, %v4423_v5 }
 0x863   : > { %4859 = vtanh.f32 %v3767_v2  ;;  %v3768_v16 = vmul.f32 0.5, %v4424_v8  ;;  %v3778_v0 = vmul.f32 0.5, %v4440_v37 }
 0x864   : > { %4861 = vtanh.f32 %v3760_v1 }
 0x865   : > { %4863 = vtanh.f32 %v4437_v14 }
 0x866   : > { %4865 = vtanh.f32 %v3768_v16 }
 0x867   : > { %4867 = vtanh.f32 %v4439_v17 }
 0x868   : > { %4869 = vtanh.f32 %v3777_v44 }
 0x869   : > { %4871 = vtanh.f32 %v3778_v0 }
 0x86c   : > { %v4858_v56 = vpop.eup %4857 }
 0x86d   : > { %v4860_v46 = vpop.eup %4859  ;;  %v3763_v45 = vmul.f32 0.5, %v4858_v56 }
 0x86e   : > { %v3771_v61 = vmul.f32 0.5, %v4860_v46  ;;  %v4862_v20 = vpop.eup %4861 }
 0x86f   : > { %v3765_v21 = vadd.f32 0.5, %v3763_v45  ;;  %v4864_v22 = vpop.eup %4863  ;;  %v3764_v24 = vmul.f32 0.5, %v4862_v20 }
 0x870   : > { %v3773_v23 = vadd.f32 0.5, %v3771_v61  ;;  %v4866_v48 = vpop.eup %4865 }
 0x871   : > { %v3787_v25 = vmul.f32 %v4864_v22, %v3765_v21  ;;  %v3766_v26 = vadd.f32 0.5, %v3764_v24  ;;  %v3772_v27 = vmul.f32 0.5, %v4866_v48  ;;  %v4868_v29 = vpop.eup %4867 }
 0x872   : > { %v3785_v12 = vmul.f32 %v3773_v23, %v3452_v19  ;;  %v4870_v33 = vpop.eup %4869 }
 0x873   : > { %v3774_v36 = vadd.f32 0.5, %v3772_v27  ;;  %v3788_v31 = vmul.f32 %v4868_v29, %v3766_v26  ;;  %v3781_v39 = vmul.f32 0.5, %v4870_v33  ;;  %v4872_v7 = vpop.eup %4871 }
 0x874   : > { %v3789_v30 = vadd.f32 %v3787_v25, %v3785_v12  ;;  %v3782_v43 = vmul.f32 0.5, %v4872_v7 }
 0x875   : > { %v3786_v32 = vmul.f32 %v3774_v36, %v5788_v47  ;;  %v3783_v11 = vadd.f32 0.5, %v3781_v39  ;;  %v4877_v47 = vld [vmem:[%s5852_s7] sm:$0xff] (!%p4333_p10)  }
 0x876   : > { %4873 = vtanh.f32 %v3789_v30  ;;  %3797 = vst [vmem:[#allocation5 + $0x10] sm:$0xff] %v3789_v30  ;;  %v3784_v51 = vadd.f32 0.5, %v3782_v43  ;;  %4358 = vmatpush3.bf16.msra.mxu0 (!%p4333_p10), %v4877_v47 }
 0x877   : > { %v3790_v57 = vadd.f32 %v3788_v31, %v3786_v32  ;;  %4359 = vmatprep.subr.bf16.mxu0 (!%p4333_p10), %v5010_v60 }
 0x879   : > { %4875 = vtanh.f32 %v3790_v57  ;;  %3798 = vst [vmem:[#allocation5 + $0x18] sm:$0xff] %v3790_v57 }
 0x87a   : > { %4360 = vmatpush3.bf16.msra.mxu0 (!%p4333_p10), %v4878_v58 }
 0x87b   : > { %4361 = vmatprep.subr.bf16.mxu0 (!%p4333_p10), %v5010_v60 }
 0x87e   : > { %4362 = vmatpush3.bf16.msra.mxu0 (!%p4333_p10), %v4879_v53 }
 0x87f   : > { %4363 = vmatprep.subr.bf16.mxu0 (!%p4333_p10), %v5010_v60 }
 0x880   : > { %v4874_v49 = vpop.eup %4873 }
 0x881   : > { %v3793_v19 = vmul.f32 %v4874_v49, %v3783_v11 }
 0x882   : > { %3802 = sbr.rel (%p4333_p10) target bundleno = 2414 (0x96e), region = 76  ;;  %4364 = vmatpush3.bf16.msra.mxu0 (!%p4333_p10), %v4880_v4 }
 0x883   : > { %v4876_v54 = vpop.eup %4875  ;;  %4365 = vmatprep.subr.bf16.mxu0 (!%p4333_p10), %v5010_v60 }
 0x884   : > { %v3794_v50 = vmul.f32 %v4876_v54, %v3784_v51 }
 0x886   : > { %v3795_v52 = vpack.c.bf16 %v3794_v50, %v3793_v19  ;;  %4366 = vmatpush3.bf16.msra.mxu0 (!%p4333_p10), %v4881_v55 }
 0x887   : > { %4367 = vmatprep.subr.bf16.mxu0 (!%p4333_p10), %v5010_v60 }
 0x888   : > { %3796 = vst [vmem:[#allocation4 + $0x8] sm:$0xff] %v3795_v52 }
 0x88a   : > { %4368 = vmatpush3.bf16.msra.mxu0 %v4882_v34 }
 0x88b   : > { %4369 = vmatprep.subr.bf16.mxu0 %v5010_v60 }
 0x88e   : > { %4370 = vmatpush3.bf16.msra.mxu0 %v4883_v9 }
 0x88f   : > { %4371 = vmatprep.subr.bf16.mxu0 %v5010_v60  ;;  %v3803_v13 = vld [vmem:[#allocation4 + $0x8] sm:$0xff] }
 0x892   : > { %4372 = vmatpush3.bf16.msra.mxu0 %v4884_v59 }
 0x895   : > { %4374 = vmatmul.mubr.bf16.vlgmr.msra.gmra.mrb[0].mxu0 %v3803_v13 }
 0x968   : > { %v3909_v35 = vpop.f32.mrb[0].mxu0 }
 0x969   : > { %v3910_v18 = vadd.f32 %v4334_v38, %v3909_v35  ;;  %v4375_v40 = vpop.f32.mrb[1].mxu0 }
 0x96a   : > { %v3912_v41 = vpop.f32.mrb[2].mxu0 }
 0x96b   : > { %3916 = vst.msk [vmem:[%s5854_s9] sm:$0xff] %vm491_vm1, %v3910_v18  ;;  %v3913_v28 = vadd.f32 %v4334_v38, %v3912_v41  ;;  %v4376_v63 = vpop.f32.mrb[3].mxu0 }
 0x96d   : > { %3917 = vst.msk [vmem:[%s5854_s9 + $0x8] sm:$0xff] %vm491_vm1, %v3913_v28 }
 0x96e PF: > { %s21_s11 = sadd.s32 1, %s4999_s11   ;;  %s5867_s30 = sld [smem:[#allocation13_spill]] }
 0x96f   : > { %p18_p11 = scmp.ge.s32.totalorder %s21_s11, 4   ;;  %s5868_s10 = smov %s5870_s18 }
 0x971   :  { %20 = sbr.rel (!%p18_p11) target bundleno = 3 (0x3), region = 115 }
 0x978   :  { %3940 = vsyncpa [#allocation7], 1 }
 0x979   :  { %3942 = vsyncpa [#allocation7 + $0x1], 1 }
 0x97a   :  { %3943 = vsyncpa [#allocation9], 1 }

</bundles_post_ra>
